<compile_context>
chip_gen: v6e
topology: v6e:2x2x1
jax: 0.10.0
libtpu: 0.0.40
codegen_flags: <defaults>
</compile_context>

<pallas_src>
import functools

import jax
import jax.numpy as jnp
from jax.experimental import pallas as pl
from jax.experimental.pallas import tpu as pltpu

# ---- config (mirrors EnLSTM `config`) ---------------------------------------
INPUT_DIM = 8
HID_DIM = 32
HALF_HID = HID_DIM // 2
NUM_LAYER = 2            # kernel below is specialized to 2 stacked layers
OUTPUT_DIM = 4
OUT_PAD = 128            # lane-dense width for the fc3 output slab
DROP_OUT = 0.3           # not applied (eval semantics)
BN_EPS = 1e-5


# ---- fully fused forward kernel ---------------------------------------------
def _fused_kernel(x_ref, wih0_ref, whh0_ref, b0_ref,
                  wih1_ref, whh1_ref, b1_ref,
                  h0_ref, c0_ref,
                  w2_ref, b2_ref, gamma_ref, beta_ref, w3_ref, b3_ref,
                  out_ref, hN_ref, cN_ref,
                  seq_sc, xg_sc):
    H = HID_DIM
    TB = x_ref.shape[0]          # T * B rows, t-major (row t*B + b == x[b, t])
    B = h0_ref.shape[1]
    T = TB // B

    def cell(gates, c_prev):
        # PyTorch gate order: i, f, g, o
        i_g = jax.nn.sigmoid(gates[:, 0:H])
        f_g = jax.nn.sigmoid(gates[:, H:2 * H])
        g_g = jnp.tanh(gates[:, 2 * H:3 * H])
        o_g = jax.nn.sigmoid(gates[:, 3 * H:4 * H])
        c_new = f_g * c_prev + i_g * g_g
        h_new = o_g * jnp.tanh(c_new)
        return h_new, c_new

    whh0 = whh0_ref[...]
    wih1 = wih1_ref[...]
    whh1 = whh1_ref[...]
    b1 = b1_ref[...]

    # Hoisted layer-0 input projection: one matmul over all T*B rows (bias
    # b_ih0 + b_hh0 folded in), stored once to a small VMEM scratch.
    xg_sc[...] = jnp.dot(x_ref[...], wih0_ref[...],
                         preferred_element_type=jnp.float32) + b0_ref[...]

    h0 = h0_ref[0]
    c0 = c0_ref[0]
    h1 = h0_ref[1]
    c1 = c0_ref[1]

    for t in range(T):                                   # static, fully unrolled
        # ---- layer 0: only the recurrent matmul stays in the loop ---------
        gates0 = xg_sc[pl.ds(t * B, B), :] + jnp.dot(
            h0, whh0, preferred_element_type=jnp.float32)
        h0, c0 = cell(gates0, c0)

        # ---- layer 1: input is this step's h0 ------------------------------
        gates1 = (jnp.dot(h0, wih1, preferred_element_type=jnp.float32)
                  + jnp.dot(h1, whh1, preferred_element_type=jnp.float32)
                  + b1)
        h1, c1 = cell(gates1, c1)

        # one contiguous (B, H) store per step, t-major flat layout
        seq_sc[pl.ds(t * B, B), :] = h1

    # final hidden / cell states written once, after the recurrence
    hN_ref[0] = h0
    hN_ref[1] = h1
    cN_ref[0] = c0
    cN_ref[1] = c1

    # ---- head: fc2 -> BatchNorm1d (batch stats) -> ReLU -> fc3 (lane-padded)
    flat = seq_sc[...]                                            # (T*B, H)
    y = jnp.dot(flat, w2_ref[...],
                preferred_element_type=jnp.float32) + b2_ref[...]
    n = y.shape[0]
    mean = jnp.sum(y, axis=0, keepdims=True) / n
    d = y - mean
    var = jnp.sum(d * d, axis=0, keepdims=True) / n               # biased var
    y = d * jax.lax.rsqrt(var + BN_EPS) * gamma_ref[...] + beta_ref[...]
    y = jnp.maximum(y, 0.0)                                       # ReLU
    out_ref[...] = (jnp.dot(y, w3_ref[...],
                            preferred_element_type=jnp.float32) + b3_ref[...])


# ---- module-level forward ----------------------------------------------------
def net_forward(x, params, hs=None):
    """x: (B, T, INPUT_DIM) batch_first, like the PyTorch module."""
    B, T, Din = x.shape
    if hs is None:
        hs = (jnp.zeros((NUM_LAYER, B, HID_DIM), jnp.float32),
              jnp.zeros((NUM_LAYER, B, HID_DIM), jnp.float32))

    (w_ih0, w_hh0, b_ih0, b_hh0) = params["lstm"][0]
    (w_ih1, w_hh1, b_ih1, b_hh1) = params["lstm"][1]

    wih0t = jnp.transpose(w_ih0)                          # (Din, 4H)
    whh0t = jnp.transpose(w_hh0)                          # (H, 4H)
    b0 = (b_ih0 + b_hh0).reshape(1, 4 * HID_DIM)
    wih1t = jnp.transpose(w_ih1)                          # (H, 4H)
    whh1t = jnp.transpose(w_hh1)                          # (H, 4H)
    b1 = (b_ih1 + b_hh1).reshape(1, 4 * HID_DIM)

    w2t = jnp.transpose(params["fc2_w"])                  # (H, H/2)
    b2 = params["fc2_b"].reshape(1, HALF_HID)
    gamma = params["bn_gamma"].reshape(1, HALF_HID)
    beta = params["bn_beta"].reshape(1, HALF_HID)

    # lane-dense padded fc3 (real outputs live in columns [0:OUTPUT_DIM])
    w3pad = jnp.zeros((HALF_HID, OUT_PAD), jnp.float32)
    w3pad = w3pad.at[:, :OUTPUT_DIM].set(jnp.transpose(params["fc3_w"]))
    b3pad = jnp.zeros((1, OUT_PAD), jnp.float32)
    b3pad = b3pad.at[:, :OUTPUT_DIM].set(params["fc3_b"])

    # t-major flat input rows (row t*B + b == x[b, t, :]); tiny XLA transpose.
    x_tb = jnp.transpose(x, (1, 0, 2)).reshape(T * B, Din)

    out_pad, h_n, c_n = pl.pallas_call(
        _fused_kernel,
        out_shape=(
            jax.ShapeDtypeStruct((T * B, OUT_PAD), jnp.float32),
            jax.ShapeDtypeStruct((NUM_LAYER, B, HID_DIM), jnp.float32),
            jax.ShapeDtypeStruct((NUM_LAYER, B, HID_DIM), jnp.float32),
        ),
        scratch_shapes=[
            pltpu.VMEM((T * B, HID_DIM), jnp.float32),      # layer-1 outputs
            pltpu.VMEM((T * B, 4 * HID_DIM), jnp.float32),  # hoisted input gates
        ],
    )(x_tb, wih0t, whh0t, b0, wih1t, whh1t, b1, hs[0], hs[1],
      w2t, b2, gamma, beta, w3pad, b3pad)

    # reorder the t-major kernel rows back to PyTorch's out.view(-1, H) order
    # (row b*T + t); tiny (T, B, OUTPUT_DIM) transpose in XLA.
    out = out_pad.reshape(T, B, OUT_PAD)[:, :, :OUTPUT_DIM]
    out = jnp.transpose(out, (1, 0, 2)).reshape(B * T, OUTPUT_DIM)
    return out, (h_n, c_n)


# ---- deterministic parameter init --------------------------------------------
def init_params(key):
    params = {"lstm": []}
    k_hid = 1.0 / jnp.sqrt(jnp.float32(HID_DIM))
    keys = jax.random.split(key, 4 * NUM_LAYER + 6)
    ki = 0
    for layer in range(NUM_LAYER):
        d_in = INPUT_DIM if layer == 0 else HID_DIM
        w_ih = jax.random.uniform(keys[ki], (4 * HID_DIM, d_in),
                                  minval=-k_hid, maxval=k_hid); ki += 1
        w_hh = jax.random.uniform(keys[ki], (4 * HID_DIM, HID_DIM),
                                  minval=-k_hid, maxval=k_hid); ki += 1
        b_ih = jax.random.uniform(keys[ki], (4 * HID_DIM,),
                                  minval=-k_hid, maxval=k_hid); ki += 1
        b_hh = jax.random.uniform(keys[ki], (4 * HID_DIM,),
                                  minval=-k_hid, maxval=k_hid); ki += 1
        params["lstm"].append((w_ih, w_hh, b_ih, b_hh))

    k2 = 1.0 / jnp.sqrt(jnp.float32(HID_DIM))
    params["fc2_w"] = jax.random.uniform(keys[ki], (HALF_HID, HID_DIM),
                                         minval=-k2, maxval=k2); ki += 1
    params["fc2_b"] = jax.random.uniform(keys[ki], (HALF_HID,),
                                         minval=-k2, maxval=k2); ki += 1
    k3 = 1.0 / jnp.sqrt(jnp.float32(HALF_HID))
    params["fc3_w"] = jax.random.uniform(keys[ki], (OUTPUT_DIM, HALF_HID),
                                         minval=-k3, maxval=k3); ki += 1
    params["fc3_b"] = jax.random.uniform(keys[ki], (OUTPUT_DIM,),
                                         minval=-k3, maxval=k3); ki += 1
    params["bn_gamma"] = jnp.ones((HALF_HID,), jnp.float32)
    params["bn_beta"] = jnp.zeros((HALF_HID,), jnp.float32)
    return jax.tree_util.tree_map(lambda a: a.astype(jnp.float32), params)


if __name__ == "__main__":
    key = jax.random.PRNGKey(0)
    pkey, xkey = jax.random.split(key)
    params = init_params(pkey)

    B, T = 2, 8
    x = jax.random.normal(xkey, (B, T, INPUT_DIM), dtype=jnp.float32)

    fwd = jax.jit(functools.partial(net_forward, params=params))
    out, (h_n, c_n) = fwd(x)
    jax.block_until_ready((out, h_n, c_n))

    assert out.shape == (B * T, OUTPUT_DIM)
    assert h_n.shape == (NUM_LAYER, B, HID_DIM)
    assert c_n.shape == (NUM_LAYER, B, HID_DIM)
    assert bool(jnp.all(jnp.isfinite(out)))
    assert bool(jnp.all(jnp.isfinite(h_n))) and bool(jnp.all(jnp.isfinite(c_n)))
    print("KERNEL_OK")
</pallas_src>

<mosaic_0001>
module attributes {stable_mosaic.version = 11 : i64} {
  func.func @_fused_kernel(%arg0: memref<16x8xf32, #tpu.memory_space<vmem>>, %arg1: memref<8x128xf32, #tpu.memory_space<vmem>>, %arg2: memref<32x128xf32, #tpu.memory_space<vmem>>, %arg3: memref<1x128xf32, #tpu.memory_space<vmem>>, %arg4: memref<32x128xf32, #tpu.memory_space<vmem>>, %arg5: memref<32x128xf32, #tpu.memory_space<vmem>>, %arg6: memref<1x128xf32, #tpu.memory_space<vmem>>, %arg7: memref<2x2x32xf32, #tpu.memory_space<vmem>>, %arg8: memref<2x2x32xf32, #tpu.memory_space<vmem>>, %arg9: memref<32x16xf32, #tpu.memory_space<vmem>>, %arg10: memref<1x16xf32, #tpu.memory_space<vmem>>, %arg11: memref<1x16xf32, #tpu.memory_space<vmem>>, %arg12: memref<1x16xf32, #tpu.memory_space<vmem>>, %arg13: memref<16x128xf32, #tpu.memory_space<vmem>>, %arg14: memref<1x128xf32, #tpu.memory_space<vmem>>, %arg15: memref<16x128xf32, #tpu.memory_space<vmem>>, %arg16: memref<2x2x32xf32, #tpu.memory_space<vmem>>, %arg17: memref<2x2x32xf32, #tpu.memory_space<vmem>>, %arg18: memref<16x32xf32, #tpu.memory_space<vmem>>, %arg19: memref<16x128xf32, #tpu.memory_space<vmem>>) attributes {dimension_semantics = [], scalar_prefetch = 0 : i64, scratch_operands = 2 : i64, tpu.core_type = #tpu.core_type<tc>} {
    %c0 = arith.constant 0 : index
    %c0_0 = arith.constant 0 : index
    %0 = vector.load %arg2[%c0, %c0_0] : memref<32x128xf32, #tpu.memory_space<vmem>>, vector<32x128xf32>
    %c0_1 = arith.constant 0 : index
    %c0_2 = arith.constant 0 : index
    %1 = vector.load %arg4[%c0_1, %c0_2] : memref<32x128xf32, #tpu.memory_space<vmem>>, vector<32x128xf32>
    %c0_3 = arith.constant 0 : index
    %c0_4 = arith.constant 0 : index
    %2 = vector.load %arg5[%c0_3, %c0_4] : memref<32x128xf32, #tpu.memory_space<vmem>>, vector<32x128xf32>
    %c0_5 = arith.constant 0 : index
    %c0_6 = arith.constant 0 : index
    %3 = vector.load %arg6[%c0_5, %c0_6] : memref<1x128xf32, #tpu.memory_space<vmem>>, vector<1x128xf32>
    %c0_7 = arith.constant 0 : index
    %c0_8 = arith.constant 0 : index
    %4 = vector.load %arg0[%c0_7, %c0_8] : memref<16x8xf32, #tpu.memory_space<vmem>>, vector<16x8xf32>
    %c0_9 = arith.constant 0 : index
    %c0_10 = arith.constant 0 : index
    %5 = vector.load %arg1[%c0_9, %c0_10] : memref<8x128xf32, #tpu.memory_space<vmem>>, vector<8x128xf32>
    %cst = arith.constant dense<0.000000e+00> : vector<16x128xf32>
    %6 = tpu.matmul %4, %5, %cst {dimension_numbers = #tpu.dot_dimension_numbers<[1], [0], [0], [1], [0, 0, 1, 1], [], []>} : vector<16x8xf32>, vector<8x128xf32>, vector<16x128xf32> -> vector<16x128xf32>
    %c0_11 = arith.constant 0 : index
    %c0_12 = arith.constant 0 : index
    %7 = vector.load %arg3[%c0_11, %c0_12] : memref<1x128xf32, #tpu.memory_space<vmem>>, vector<1x128xf32>
    %8 = vector.broadcast %7 : vector<1x128xf32> to vector<16x128xf32>
    %9 = arith.addf %6, %8 : vector<16x128xf32>
    %c0_13 = arith.constant 0 : index
    %c0_14 = arith.constant 0 : index
    %10 = vector.load %arg19[%c0_13, %c0_14] : memref<16x128xf32, #tpu.memory_space<vmem>>, vector<16x128xf32>
    tpu.vector_store %arg19[%c0_13, %c0_14], %9 {strides = array<i32>} : memref<16x128xf32, #tpu.memory_space<vmem>>, vector<16x128xf32>,
    %c0_15 = arith.constant 0 : index
    %c0_16 = arith.constant 0 : index
    %c0_17 = arith.constant 0 : index
    %11 = vector.load %arg7[%c0_15, %c0_16, %c0_17] : memref<2x2x32xf32, #tpu.memory_space<vmem>>, vector<1x2x32xf32>
    %12 = vector.shape_cast %11 : vector<1x2x32xf32> to vector<2x32xf32>
    %c0_18 = arith.constant 0 : index
    %c0_19 = arith.constant 0 : index
    %c0_20 = arith.constant 0 : index
    %13 = vector.load %arg8[%c0_18, %c0_19, %c0_20] : memref<2x2x32xf32, #tpu.memory_space<vmem>>, vector<1x2x32xf32>
    %14 = vector.shape_cast %13 : vector<1x2x32xf32> to vector<2x32xf32>
    %c1 = arith.constant 1 : index
    %c0_21 = arith.constant 0 : index
    %c0_22 = arith.constant 0 : index
    %15 = vector.load %arg7[%c1, %c0_21, %c0_22] : memref<2x2x32xf32, #tpu.memory_space<vmem>>, vector<1x2x32xf32>
    %16 = vector.shape_cast %15 : vector<1x2x32xf32> to vector<2x32xf32>
    %c1_23 = arith.constant 1 : index
    %c0_24 = arith.constant 0 : index
    %c0_25 = arith.constant 0 : index
    %17 = vector.load %arg8[%c1_23, %c0_24, %c0_25] : memref<2x2x32xf32, #tpu.memory_space<vmem>>, vector<1x2x32xf32>
    %18 = vector.shape_cast %17 : vector<1x2x32xf32> to vector<2x32xf32>
    %c0_26 = arith.constant 0 : index
    %c0_27 = arith.constant 0 : index
    %19 = vector.load %arg19[%c0_26, %c0_27] : memref<16x128xf32, #tpu.memory_space<vmem>>, vector<2x128xf32>
    %cst_28 = arith.constant dense<0.000000e+00> : vector<2x128xf32>
    %20 = tpu.matmul %12, %0, %cst_28 {dimension_numbers = #tpu.dot_dimension_numbers<[1], [0], [0], [1], [0, 0, 1, 1], [], []>} : vector<2x32xf32>, vector<32x128xf32>, vector<2x128xf32> -> vector<2x128xf32>
    %21 = arith.addf %19, %20 : vector<2x128xf32>
    %22 = vector.extract_strided_slice %21 {offsets = [0, 0], sizes = [2, 32], strides = [1, 1]} : vector<2x128xf32> to vector<2x32xf32>
    %23 = arith.negf %22 : vector<2x32xf32>
    %24 = math.exp %23 : vector<2x32xf32>
    %cst_29 = arith.constant 1.000000e+00 : f32
    %25 = vector.broadcast %cst_29 : f32 to vector<2x32xf32>
    %26 = arith.addf %25, %24 : vector<2x32xf32>
    %27 = arith.divf %25, %26 : vector<2x32xf32>
    %28 = vector.extract_strided_slice %21 {offsets = [0, 32], sizes = [2, 32], strides = [1, 1]} : vector<2x128xf32> to vector<2x32xf32>
    %29 = arith.negf %28 : vector<2x32xf32>
    %30 = math.exp %29 : vector<2x32xf32>
    %cst_30 = arith.constant 1.000000e+00 : f32
    %31 = vector.broadcast %cst_30 : f32 to vector<2x32xf32>
    %32 = arith.addf %31, %30 : vector<2x32xf32>
    %33 = arith.divf %31, %32 : vector<2x32xf32>
    %34 = vector.extract_strided_slice %21 {offsets = [0, 64], sizes = [2, 32], strides = [1, 1]} : vector<2x128xf32> to vector<2x32xf32>
    %35 = math.tanh %34 : vector<2x32xf32>
    %36 = vector.extract_strided_slice %21 {offsets = [0, 96], sizes = [2, 32], strides = [1, 1]} : vector<2x128xf32> to vector<2x32xf32>
    %37 = arith.negf %36 : vector<2x32xf32>
    %38 = math.exp %37 : vector<2x32xf32>
    %cst_31 = arith.constant 1.000000e+00 : f32
    %39 = vector.broadcast %cst_31 : f32 to vector<2x32xf32>
    %40 = arith.addf %39, %38 : vector<2x32xf32>
    %41 = arith.divf %39, %40 : vector<2x32xf32>
    %42 = arith.mulf %33, %14 : vector<2x32xf32>
    %43 = arith.mulf %27, %35 : vector<2x32xf32>
    %44 = arith.addf %42, %43 : vector<2x32xf32>
    %45 = math.tanh %44 : vector<2x32xf32>
    %46 = arith.mulf %41, %45 : vector<2x32xf32>
    %cst_32 = arith.constant dense<0.000000e+00> : vector<2x128xf32>
    %47 = tpu.matmul %46, %1, %cst_32 {dimension_numbers = #tpu.dot_dimension_numbers<[1], [0], [0], [1], [0, 0, 1, 1], [], []>} : vector<2x32xf32>, vector<32x128xf32>, vector<2x128xf32> -> vector<2x128xf32>
    %cst_33 = arith.constant dense<0.000000e+00> : vector<2x128xf32>
    %48 = tpu.matmul %16, %2, %cst_33 {dimension_numbers = #tpu.dot_dimension_numbers<[1], [0], [0], [1], [0, 0, 1, 1], [], []>} : vector<2x32xf32>, vector<32x128xf32>, vector<2x128xf32> -> vector<2x128xf32>
    %49 = arith.addf %47, %48 : vector<2x128xf32>
    %50 = vector.broadcast %3 : vector<1x128xf32> to vector<2x128xf32>
    %51 = arith.addf %49, %50 : vector<2x128xf32>
    %52 = vector.extract_strided_slice %51 {offsets = [0, 0], sizes = [2, 32], strides = [1, 1]} : vector<2x128xf32> to vector<2x32xf32>
    %53 = arith.negf %52 : vector<2x32xf32>
    %54 = math.exp %53 : vector<2x32xf32>
    %cst_34 = arith.constant 1.000000e+00 : f32
    %55 = vector.broadcast %cst_34 : f32 to vector<2x32xf32>
    %56 = arith.addf %55, %54 : vector<2x32xf32>
    %57 = arith.divf %55, %56 : vector<2x32xf32>
    %58 = vector.extract_strided_slice %51 {offsets = [0, 32], sizes = [2, 32], strides = [1, 1]} : vector<2x128xf32> to vector<2x32xf32>
    %59 = arith.negf %58 : vector<2x32xf32>
    %60 = math.exp %59 : vector<2x32xf32>
    %cst_35 = arith.constant 1.000000e+00 : f32
    %61 = vector.broadcast %cst_35 : f32 to vector<2x32xf32>
    %62 = arith.addf %61, %60 : vector<2x32xf32>
    %63 = arith.divf %61, %62 : vector<2x32xf32>
    %64 = vector.extract_strided_slice %51 {offsets = [0, 64], sizes = [2, 32], strides = [1, 1]} : vector<2x128xf32> to vector<2x32xf32>
    %65 = math.tanh %64 : vector<2x32xf32>
    %66 = vector.extract_strided_slice %51 {offsets = [0, 96], sizes = [2, 32], strides = [1, 1]} : vector<2x128xf32> to vector<2x32xf32>
    %67 = arith.negf %66 : vector<2x32xf32>
    %68 = math.exp %67 : vector<2x32xf32>
    %cst_36 = arith.constant 1.000000e+00 : f32
    %69 = vector.broadcast %cst_36 : f32 to vector<2x32xf32>
    %70 = arith.addf %69, %68 : vector<2x32xf32>
    %71 = arith.divf %69, %70 : vector<2x32xf32>
    %72 = arith.mulf %63, %18 : vector<2x32xf32>
    %73 = arith.mulf %57, %65 : vector<2x32xf32>
    %74 = arith.addf %72, %73 : vector<2x32xf32>
    %75 = math.tanh %74 : vector<2x32xf32>
    %76 = arith.mulf %71, %75 : vector<2x32xf32>
    %c0_37 = arith.constant 0 : index
    %c0_38 = arith.constant 0 : index
    %77 = vector.load %arg18[%c0_37, %c0_38] : memref<16x32xf32, #tpu.memory_space<vmem>>, vector<2x32xf32>
    tpu.vector_store %arg18[%c0_37, %c0_38], %76 {strides = array<i32>} : memref<16x32xf32, #tpu.memory_space<vmem>>, vector<2x32xf32>,
    %c2 = arith.constant 2 : index
    %c0_39 = arith.constant 0 : index
    %78 = vector.load %arg19[%c2, %c0_39] : memref<16x128xf32, #tpu.memory_space<vmem>>, vector<2x128xf32>
    %cst_40 = arith.constant dense<0.000000e+00> : vector<2x128xf32>
    %79 = tpu.matmul %46, %0, %cst_40 {dimension_numbers = #tpu.dot_dimension_numbers<[1], [0], [0], [1], [0, 0, 1, 1], [], []>} : vector<2x32xf32>, vector<32x128xf32>, vector<2x128xf32> -> vector<2x128xf32>
    %80 = arith.addf %78, %79 : vector<2x128xf32>
    %81 = vector.extract_strided_slice %80 {offsets = [0, 0], sizes = [2, 32], strides = [1, 1]} : vector<2x128xf32> to vector<2x32xf32>
    %82 = arith.negf %81 : vector<2x32xf32>
    %83 = math.exp %82 : vector<2x32xf32>
    %cst_41 = arith.constant 1.000000e+00 : f32
    %84 = vector.broadcast %cst_41 : f32 to vector<2x32xf32>
    %85 = arith.addf %84, %83 : vector<2x32xf32>
    %86 = arith.divf %84, %85 : vector<2x32xf32>
    %87 = vector.extract_strided_slice %80 {offsets = [0, 32], sizes = [2, 32], strides = [1, 1]} : vector<2x128xf32> to vector<2x32xf32>
    %88 = arith.negf %87 : vector<2x32xf32>
    %89 = math.exp %88 : vector<2x32xf32>
    %cst_42 = arith.constant 1.000000e+00 : f32
    %90 = vector.broadcast %cst_42 : f32 to vector<2x32xf32>
    %91 = arith.addf %90, %89 : vector<2x32xf32>
    %92 = arith.divf %90, %91 : vector<2x32xf32>
    %93 = vector.extract_strided_slice %80 {offsets = [0, 64], sizes = [2, 32], strides = [1, 1]} : vector<2x128xf32> to vector<2x32xf32>
    %94 = math.tanh %93 : vector<2x32xf32>
    %95 = vector.extract_strided_slice %80 {offsets = [0, 96], sizes = [2, 32], strides = [1, 1]} : vector<2x128xf32> to vector<2x32xf32>
    %96 = arith.negf %95 : vector<2x32xf32>
    %97 = math.exp %96 : vector<2x32xf32>
    %cst_43 = arith.constant 1.000000e+00 : f32
    %98 = vector.broadcast %cst_43 : f32 to vector<2x32xf32>
    %99 = arith.addf %98, %97 : vector<2x32xf32>
    %100 = arith.divf %98, %99 : vector<2x32xf32>
    %101 = arith.mulf %92, %44 : vector<2x32xf32>
    %102 = arith.mulf %86, %94 : vector<2x32xf32>
    %103 = arith.addf %101, %102 : vector<2x32xf32>
    %104 = math.tanh %103 : vector<2x32xf32>
    %105 = arith.mulf %100, %104 : vector<2x32xf32>
    %cst_44 = arith.constant dense<0.000000e+00> : vector<2x128xf32>
    %106 = tpu.matmul %105, %1, %cst_44 {dimension_numbers = #tpu.dot_dimension_numbers<[1], [0], [0], [1], [0, 0, 1, 1], [], []>} : vector<2x32xf32>, vector<32x128xf32>, vector<2x128xf32> -> vector<2x128xf32>
    %cst_45 = arith.constant dense<0.000000e+00> : vector<2x128xf32>
    %107 = tpu.matmul %76, %2, %cst_45 {dimension_numbers = #tpu.dot_dimension_numbers<[1], [0], [0], [1], [0, 0, 1, 1], [], []>} : vector<2x32xf32>, vector<32x128xf32>, vector<2x128xf32> -> vector<2x128xf32>
    %108 = arith.addf %106, %107 : vector<2x128xf32>
    %109 = vector.broadcast %3 : vector<1x128xf32> to vector<2x128xf32>
    %110 = arith.addf %108, %109 : vector<2x128xf32>
    %111 = vector.extract_strided_slice %110 {offsets = [0, 0], sizes = [2, 32], strides = [1, 1]} : vector<2x128xf32> to vector<2x32xf32>
    %112 = arith.negf %111 : vector<2x32xf32>
    %113 = math.exp %112 : vector<2x32xf32>
    %cst_46 = arith.constant 1.000000e+00 : f32
    %114 = vector.broadcast %cst_46 : f32 to vector<2x32xf32>
    %115 = arith.addf %114, %113 : vector<2x32xf32>
    %116 = arith.divf %114, %115 : vector<2x32xf32>
    %117 = vector.extract_strided_slice %110 {offsets = [0, 32], sizes = [2, 32], strides = [1, 1]} : vector<2x128xf32> to vector<2x32xf32>
    %118 = arith.negf %117 : vector<2x32xf32>
    %119 = math.exp %118 : vector<2x32xf32>
    %cst_47 = arith.constant 1.000000e+00 : f32
    %120 = vector.broadcast %cst_47 : f32 to vector<2x32xf32>
    %121 = arith.addf %120, %119 : vector<2x32xf32>
    %122 = arith.divf %120, %121 : vector<2x32xf32>
    %123 = vector.extract_strided_slice %110 {offsets = [0, 64], sizes = [2, 32], strides = [1, 1]} : vector<2x128xf32> to vector<2x32xf32>
    %124 = math.tanh %123 : vector<2x32xf32>
    %125 = vector.extract_strided_slice %110 {offsets = [0, 96], sizes = [2, 32], strides = [1, 1]} : vector<2x128xf32> to vector<2x32xf32>
    %126 = arith.negf %125 : vector<2x32xf32>
    %127 = math.exp %126 : vector<2x32xf32>
    %cst_48 = arith.constant 1.000000e+00 : f32
    %128 = vector.broadcast %cst_48 : f32 to vector<2x32xf32>
    %129 = arith.addf %128, %127 : vector<2x32xf32>
    %130 = arith.divf %128, %129 : vector<2x32xf32>
    %131 = arith.mulf %122, %74 : vector<2x32xf32>
    %132 = arith.mulf %116, %124 : vector<2x32xf32>
    %133 = arith.addf %131, %132 : vector<2x32xf32>
    %134 = math.tanh %133 : vector<2x32xf32>
    %135 = arith.mulf %130, %134 : vector<2x32xf32>
    %c2_49 = arith.constant 2 : index
    %c0_50 = arith.constant 0 : index
    %136 = vector.load %arg18[%c2_49, %c0_50] : memref<16x32xf32, #tpu.memory_space<vmem>>, vector<2x32xf32>
    tpu.vector_store %arg18[%c2_49, %c0_50], %135 {strides = array<i32>} : memref<16x32xf32, #tpu.memory_space<vmem>>, vector<2x32xf32>,
    %c4 = arith.constant 4 : index
    %c0_51 = arith.constant 0 : index
    %137 = vector.load %arg19[%c4, %c0_51] : memref<16x128xf32, #tpu.memory_space<vmem>>, vector<2x128xf32>
    %cst_52 = arith.constant dense<0.000000e+00> : vector<2x128xf32>
    %138 = tpu.matmul %105, %0, %cst_52 {dimension_numbers = #tpu.dot_dimension_numbers<[1], [0], [0], [1], [0, 0, 1, 1], [], []>} : vector<2x32xf32>, vector<32x128xf32>, vector<2x128xf32> -> vector<2x128xf32>
    %139 = arith.addf %137, %138 : vector<2x128xf32>
    %140 = vector.extract_strided_slice %139 {offsets = [0, 0], sizes = [2, 32], strides = [1, 1]} : vector<2x128xf32> to vector<2x32xf32>
    %141 = arith.negf %140 : vector<2x32xf32>
    %142 = math.exp %141 : vector<2x32xf32>
    %cst_53 = arith.constant 1.000000e+00 : f32
    %143 = vector.broadcast %cst_53 : f32 to vector<2x32xf32>
    %144 = arith.addf %143, %142 : vector<2x32xf32>
    %145 = arith.divf %143, %144 : vector<2x32xf32>
    %146 = vector.extract_strided_slice %139 {offsets = [0, 32], sizes = [2, 32], strides = [1, 1]} : vector<2x128xf32> to vector<2x32xf32>
    %147 = arith.negf %146 : vector<2x32xf32>
    %148 = math.exp %147 : vector<2x32xf32>
    %cst_54 = arith.constant 1.000000e+00 : f32
    %149 = vector.broadcast %cst_54 : f32 to vector<2x32xf32>
    %150 = arith.addf %149, %148 : vector<2x32xf32>
    %151 = arith.divf %149, %150 : vector<2x32xf32>
    %152 = vector.extract_strided_slice %139 {offsets = [0, 64], sizes = [2, 32], strides = [1, 1]} : vector<2x128xf32> to vector<2x32xf32>
    %153 = math.tanh %152 : vector<2x32xf32>
    %154 = vector.extract_strided_slice %139 {offsets = [0, 96], sizes = [2, 32], strides = [1, 1]} : vector<2x128xf32> to vector<2x32xf32>
    %155 = arith.negf %154 : vector<2x32xf32>
    %156 = math.exp %155 : vector<2x32xf32>
    %cst_55 = arith.constant 1.000000e+00 : f32
    %157 = vector.broadcast %cst_55 : f32 to vector<2x32xf32>
    %158 = arith.addf %157, %156 : vector<2x32xf32>
    %159 = arith.divf %157, %158 : vector<2x32xf32>
    %160 = arith.mulf %151, %103 : vector<2x32xf32>
    %161 = arith.mulf %145, %153 : vector<2x32xf32>
    %162 = arith.addf %160, %161 : vector<2x32xf32>
    %163 = math.tanh %162 : vector<2x32xf32>
    %164 = arith.mulf %159, %163 : vector<2x32xf32>
    %cst_56 = arith.constant dense<0.000000e+00> : vector<2x128xf32>
    %165 = tpu.matmul %164, %1, %cst_56 {dimension_numbers = #tpu.dot_dimension_numbers<[1], [0], [0], [1], [0, 0, 1, 1], [], []>} : vector<2x32xf32>, vector<32x128xf32>, vector<2x128xf32> -> vector<2x128xf32>
    %cst_57 = arith.constant dense<0.000000e+00> : vector<2x128xf32>
    %166 = tpu.matmul %135, %2, %cst_57 {dimension_numbers = #tpu.dot_dimension_numbers<[1], [0], [0], [1], [0, 0, 1, 1], [], []>} : vector<2x32xf32>, vector<32x128xf32>, vector<2x128xf32> -> vector<2x128xf32>
    %167 = arith.addf %165, %166 : vector<2x128xf32>
    %168 = vector.broadcast %3 : vector<1x128xf32> to vector<2x128xf32>
    %169 = arith.addf %167, %168 : vector<2x128xf32>
    %170 = vector.extract_strided_slice %169 {offsets = [0, 0], sizes = [2, 32], strides = [1, 1]} : vector<2x128xf32> to vector<2x32xf32>
    %171 = arith.negf %170 : vector<2x32xf32>
    %172 = math.exp %171 : vector<2x32xf32>
    %cst_58 = arith.constant 1.000000e+00 : f32
    %173 = vector.broadcast %cst_58 : f32 to vector<2x32xf32>
    %174 = arith.addf %173, %172 : vector<2x32xf32>
    %175 = arith.divf %173, %174 : vector<2x32xf32>
    %176 = vector.extract_strided_slice %169 {offsets = [0, 32], sizes = [2, 32], strides = [1, 1]} : vector<2x128xf32> to vector<2x32xf32>
    %177 = arith.negf %176 : vector<2x32xf32>
    %178 = math.exp %177 : vector<2x32xf32>
    %cst_59 = arith.constant 1.000000e+00 : f32
    %179 = vector.broadcast %cst_59 : f32 to vector<2x32xf32>
    %180 = arith.addf %179, %178 : vector<2x32xf32>
    %181 = arith.divf %179, %180 : vector<2x32xf32>
    %182 = vector.extract_strided_slice %169 {offsets = [0, 64], sizes = [2, 32], strides = [1, 1]} : vector<2x128xf32> to vector<2x32xf32>
    %183 = math.tanh %182 : vector<2x32xf32>
    %184 = vector.extract_strided_slice %169 {offsets = [0, 96], sizes = [2, 32], strides = [1, 1]} : vector<2x128xf32> to vector<2x32xf32>
    %185 = arith.negf %184 : vector<2x32xf32>
    %186 = math.exp %185 : vector<2x32xf32>
    %cst_60 = arith.constant 1.000000e+00 : f32
    %187 = vector.broadcast %cst_60 : f32 to vector<2x32xf32>
    %188 = arith.addf %187, %186 : vector<2x32xf32>
    %189 = arith.divf %187, %188 : vector<2x32xf32>
    %190 = arith.mulf %181, %133 : vector<2x32xf32>
    %191 = arith.mulf %175, %183 : vector<2x32xf32>
    %192 = arith.addf %190, %191 : vector<2x32xf32>
    %193 = math.tanh %192 : vector<2x32xf32>
    %194 = arith.mulf %189, %193 : vector<2x32xf32>
    %c4_61 = arith.constant 4 : index
    %c0_62 = arith.constant 0 : index
    %195 = vector.load %arg18[%c4_61, %c0_62] : memref<16x32xf32, #tpu.memory_space<vmem>>, vector<2x32xf32>
    tpu.vector_store %arg18[%c4_61, %c0_62], %194 {strides = array<i32>} : memref<16x32xf32, #tpu.memory_space<vmem>>, vector<2x32xf32>,
    %c6 = arith.constant 6 : index
    %c0_63 = arith.constant 0 : index
    %196 = vector.load %arg19[%c6, %c0_63] : memref<16x128xf32, #tpu.memory_space<vmem>>, vector<2x128xf32>
    %cst_64 = arith.constant dense<0.000000e+00> : vector<2x128xf32>
    %197 = tpu.matmul %164, %0, %cst_64 {dimension_numbers = #tpu.dot_dimension_numbers<[1], [0], [0], [1], [0, 0, 1, 1], [], []>} : vector<2x32xf32>, vector<32x128xf32>, vector<2x128xf32> -> vector<2x128xf32>
    %198 = arith.addf %196, %197 : vector<2x128xf32>
    %199 = vector.extract_strided_slice %198 {offsets = [0, 0], sizes = [2, 32], strides = [1, 1]} : vector<2x128xf32> to vector<2x32xf32>
    %200 = arith.negf %199 : vector<2x32xf32>
    %201 = math.exp %200 : vector<2x32xf32>
    %cst_65 = arith.constant 1.000000e+00 : f32
    %202 = vector.broadcast %cst_65 : f32 to vector<2x32xf32>
    %203 = arith.addf %202, %201 : vector<2x32xf32>
    %204 = arith.divf %202, %203 : vector<2x32xf32>
    %205 = vector.extract_strided_slice %198 {offsets = [0, 32], sizes = [2, 32], strides = [1, 1]} : vector<2x128xf32> to vector<2x32xf32>
    %206 = arith.negf %205 : vector<2x32xf32>
    %207 = math.exp %206 : vector<2x32xf32>
    %cst_66 = arith.constant 1.000000e+00 : f32
    %208 = vector.broadcast %cst_66 : f32 to vector<2x32xf32>
    %209 = arith.addf %208, %207 : vector<2x32xf32>
    %210 = arith.divf %208, %209 : vector<2x32xf32>
    %211 = vector.extract_strided_slice %198 {offsets = [0, 64], sizes = [2, 32], strides = [1, 1]} : vector<2x128xf32> to vector<2x32xf32>
    %212 = math.tanh %211 : vector<2x32xf32>
    %213 = vector.extract_strided_slice %198 {offsets = [0, 96], sizes = [2, 32], strides = [1, 1]} : vector<2x128xf32> to vector<2x32xf32>
    %214 = arith.negf %213 : vector<2x32xf32>
    %215 = math.exp %214 : vector<2x32xf32>
    %cst_67 = arith.constant 1.000000e+00 : f32
    %216 = vector.broadcast %cst_67 : f32 to vector<2x32xf32>
    %217 = arith.addf %216, %215 : vector<2x32xf32>
    %218 = arith.divf %216, %217 : vector<2x32xf32>
    %219 = arith.mulf %210, %162 : vector<2x32xf32>
    %220 = arith.mulf %204, %212 : vector<2x32xf32>
    %221 = arith.addf %219, %220 : vector<2x32xf32>
    %222 = math.tanh %221 : vector<2x32xf32>
    %223 = arith.mulf %218, %222 : vector<2x32xf32>
    %cst_68 = arith.constant dense<0.000000e+00> : vector<2x128xf32>
    %224 = tpu.matmul %223, %1, %cst_68 {dimension_numbers = #tpu.dot_dimension_numbers<[1], [0], [0], [1], [0, 0, 1, 1], [], []>} : vector<2x32xf32>, vector<32x128xf32>, vector<2x128xf32> -> vector<2x128xf32>
    %cst_69 = arith.constant dense<0.000000e+00> : vector<2x128xf32>
    %225 = tpu.matmul %194, %2, %cst_69 {dimension_numbers = #tpu.dot_dimension_numbers<[1], [0], [0], [1], [0, 0, 1, 1], [], []>} : vector<2x32xf32>, vector<32x128xf32>, vector<2x128xf32> -> vector<2x128xf32>
    %226 = arith.addf %224, %225 : vector<2x128xf32>
    %227 = vector.broadcast %3 : vector<1x128xf32> to vector<2x128xf32>
    %228 = arith.addf %226, %227 : vector<2x128xf32>
    %229 = vector.extract_strided_slice %228 {offsets = [0, 0], sizes = [2, 32], strides = [1, 1]} : vector<2x128xf32> to vector<2x32xf32>
    %230 = arith.negf %229 : vector<2x32xf32>
    %231 = math.exp %230 : vector<2x32xf32>
    %cst_70 = arith.constant 1.000000e+00 : f32
    %232 = vector.broadcast %cst_70 : f32 to vector<2x32xf32>
    %233 = arith.addf %232, %231 : vector<2x32xf32>
    %234 = arith.divf %232, %233 : vector<2x32xf32>
    %235 = vector.extract_strided_slice %228 {offsets = [0, 32], sizes = [2, 32], strides = [1, 1]} : vector<2x128xf32> to vector<2x32xf32>
    %236 = arith.negf %235 : vector<2x32xf32>
    %237 = math.exp %236 : vector<2x32xf32>
    %cst_71 = arith.constant 1.000000e+00 : f32
    %238 = vector.broadcast %cst_71 : f32 to vector<2x32xf32>
    %239 = arith.addf %238, %237 : vector<2x32xf32>
    %240 = arith.divf %238, %239 : vector<2x32xf32>
    %241 = vector.extract_strided_slice %228 {offsets = [0, 64], sizes = [2, 32], strides = [1, 1]} : vector<2x128xf32> to vector<2x32xf32>
    %242 = math.tanh %241 : vector<2x32xf32>
    %243 = vector.extract_strided_slice %228 {offsets = [0, 96], sizes = [2, 32], strides = [1, 1]} : vector<2x128xf32> to vector<2x32xf32>
    %244 = arith.negf %243 : vector<2x32xf32>
    %245 = math.exp %244 : vector<2x32xf32>
    %cst_72 = arith.constant 1.000000e+00 : f32
    %246 = vector.broadcast %cst_72 : f32 to vector<2x32xf32>
    %247 = arith.addf %246, %245 : vector<2x32xf32>
    %248 = arith.divf %246, %247 : vector<2x32xf32>
    %249 = arith.mulf %240, %192 : vector<2x32xf32>
    %250 = arith.mulf %234, %242 : vector<2x32xf32>
    %251 = arith.addf %249, %250 : vector<2x32xf32>
    %252 = math.tanh %251 : vector<2x32xf32>
    %253 = arith.mulf %248, %252 : vector<2x32xf32>
    %c6_73 = arith.constant 6 : index
    %c0_74 = arith.constant 0 : index
    %254 = vector.load %arg18[%c6_73, %c0_74] : memref<16x32xf32, #tpu.memory_space<vmem>>, vector<2x32xf32>
    tpu.vector_store %arg18[%c6_73, %c0_74], %253 {strides = array<i32>} : memref<16x32xf32, #tpu.memory_space<vmem>>, vector<2x32xf32>,
    %c8 = arith.constant 8 : index
    %c0_75 = arith.constant 0 : index
    %255 = vector.load %arg19[%c8, %c0_75] : memref<16x128xf32, #tpu.memory_space<vmem>>, vector<2x128xf32>
    %cst_76 = arith.constant dense<0.000000e+00> : vector<2x128xf32>
    %256 = tpu.matmul %223, %0, %cst_76 {dimension_numbers = #tpu.dot_dimension_numbers<[1], [0], [0], [1], [0, 0, 1, 1], [], []>} : vector<2x32xf32>, vector<32x128xf32>, vector<2x128xf32> -> vector<2x128xf32>
    %257 = arith.addf %255, %256 : vector<2x128xf32>
    %258 = vector.extract_strided_slice %257 {offsets = [0, 0], sizes = [2, 32], strides = [1, 1]} : vector<2x128xf32> to vector<2x32xf32>
    %259 = arith.negf %258 : vector<2x32xf32>
    %260 = math.exp %259 : vector<2x32xf32>
    %cst_77 = arith.constant 1.000000e+00 : f32
    %261 = vector.broadcast %cst_77 : f32 to vector<2x32xf32>
    %262 = arith.addf %261, %260 : vector<2x32xf32>
    %263 = arith.divf %261, %262 : vector<2x32xf32>
    %264 = vector.extract_strided_slice %257 {offsets = [0, 32], sizes = [2, 32], strides = [1, 1]} : vector<2x128xf32> to vector<2x32xf32>
    %265 = arith.negf %264 : vector<2x32xf32>
    %266 = math.exp %265 : vector<2x32xf32>
    %cst_78 = arith.constant 1.000000e+00 : f32
    %267 = vector.broadcast %cst_78 : f32 to vector<2x32xf32>
    %268 = arith.addf %267, %266 : vector<2x32xf32>
    %269 = arith.divf %267, %268 : vector<2x32xf32>
    %270 = vector.extract_strided_slice %257 {offsets = [0, 64], sizes = [2, 32], strides = [1, 1]} : vector<2x128xf32> to vector<2x32xf32>
    %271 = math.tanh %270 : vector<2x32xf32>
    %272 = vector.extract_strided_slice %257 {offsets = [0, 96], sizes = [2, 32], strides = [1, 1]} : vector<2x128xf32> to vector<2x32xf32>
    %273 = arith.negf %272 : vector<2x32xf32>
    %274 = math.exp %273 : vector<2x32xf32>
    %cst_79 = arith.constant 1.000000e+00 : f32
    %275 = vector.broadcast %cst_79 : f32 to vector<2x32xf32>
    %276 = arith.addf %275, %274 : vector<2x32xf32>
    %277 = arith.divf %275, %276 : vector<2x32xf32>
    %278 = arith.mulf %269, %221 : vector<2x32xf32>
    %279 = arith.mulf %263, %271 : vector<2x32xf32>
    %280 = arith.addf %278, %279 : vector<2x32xf32>
    %281 = math.tanh %280 : vector<2x32xf32>
    %282 = arith.mulf %277, %281 : vector<2x32xf32>
    %cst_80 = arith.constant dense<0.000000e+00> : vector<2x128xf32>
    %283 = tpu.matmul %282, %1, %cst_80 {dimension_numbers = #tpu.dot_dimension_numbers<[1], [0], [0], [1], [0, 0, 1, 1], [], []>} : vector<2x32xf32>, vector<32x128xf32>, vector<2x128xf32> -> vector<2x128xf32>
    %cst_81 = arith.constant dense<0.000000e+00> : vector<2x128xf32>
    %284 = tpu.matmul %253, %2, %cst_81 {dimension_numbers = #tpu.dot_dimension_numbers<[1], [0], [0], [1], [0, 0, 1, 1], [], []>} : vector<2x32xf32>, vector<32x128xf32>, vector<2x128xf32> -> vector<2x128xf32>
    %285 = arith.addf %283, %284 : vector<2x128xf32>
    %286 = vector.broadcast %3 : vector<1x128xf32> to vector<2x128xf32>
    %287 = arith.addf %285, %286 : vector<2x128xf32>
    %288 = vector.extract_strided_slice %287 {offsets = [0, 0], sizes = [2, 32], strides = [1, 1]} : vector<2x128xf32> to vector<2x32xf32>
    %289 = arith.negf %288 : vector<2x32xf32>
    %290 = math.exp %289 : vector<2x32xf32>
    %cst_82 = arith.constant 1.000000e+00 : f32
    %291 = vector.broadcast %cst_82 : f32 to vector<2x32xf32>
    %292 = arith.addf %291, %290 : vector<2x32xf32>
    %293 = arith.divf %291, %292 : vector<2x32xf32>
    %294 = vector.extract_strided_slice %287 {offsets = [0, 32], sizes = [2, 32], strides = [1, 1]} : vector<2x128xf32> to vector<2x32xf32>
    %295 = arith.negf %294 : vector<2x32xf32>
    %296 = math.exp %295 : vector<2x32xf32>
    %cst_83 = arith.constant 1.000000e+00 : f32
    %297 = vector.broadcast %cst_83 : f32 to vector<2x32xf32>
    %298 = arith.addf %297, %296 : vector<2x32xf32>
    %299 = arith.divf %297, %298 : vector<2x32xf32>
    %300 = vector.extract_strided_slice %287 {offsets = [0, 64], sizes = [2, 32], strides = [1, 1]} : vector<2x128xf32> to vector<2x32xf32>
    %301 = math.tanh %300 : vector<2x32xf32>
    %302 = vector.extract_strided_slice %287 {offsets = [0, 96], sizes = [2, 32], strides = [1, 1]} : vector<2x128xf32> to vector<2x32xf32>
    %303 = arith.negf %302 : vector<2x32xf32>
    %304 = math.exp %303 : vector<2x32xf32>
    %cst_84 = arith.constant 1.000000e+00 : f32
    %305 = vector.broadcast %cst_84 : f32 to vector<2x32xf32>
    %306 = arith.addf %305, %304 : vector<2x32xf32>
    %307 = arith.divf %305, %306 : vector<2x32xf32>
    %308 = arith.mulf %299, %251 : vector<2x32xf32>
    %309 = arith.mulf %293, %301 : vector<2x32xf32>
    %310 = arith.addf %308, %309 : vector<2x32xf32>
    %311 = math.tanh %310 : vector<2x32xf32>
    %312 = arith.mulf %307, %311 : vector<2x32xf32>
    %c8_85 = arith.constant 8 : index
    %c0_86 = arith.constant 0 : index
    %313 = vector.load %arg18[%c8_85, %c0_86] : memref<16x32xf32, #tpu.memory_space<vmem>>, vector<2x32xf32>
    tpu.vector_store %arg18[%c8_85, %c0_86], %312 {strides = array<i32>} : memref<16x32xf32, #tpu.memory_space<vmem>>, vector<2x32xf32>,
    %c10 = arith.constant 10 : index
    %c0_87 = arith.constant 0 : index
    %314 = vector.load %arg19[%c10, %c0_87] : memref<16x128xf32, #tpu.memory_space<vmem>>, vector<2x128xf32>
    %cst_88 = arith.constant dense<0.000000e+00> : vector<2x128xf32>
    %315 = tpu.matmul %282, %0, %cst_88 {dimension_numbers = #tpu.dot_dimension_numbers<[1], [0], [0], [1], [0, 0, 1, 1], [], []>} : vector<2x32xf32>, vector<32x128xf32>, vector<2x128xf32> -> vector<2x128xf32>
    %316 = arith.addf %314, %315 : vector<2x128xf32>
    %317 = vector.extract_strided_slice %316 {offsets = [0, 0], sizes = [2, 32], strides = [1, 1]} : vector<2x128xf32> to vector<2x32xf32>
    %318 = arith.negf %317 : vector<2x32xf32>
    %319 = math.exp %318 : vector<2x32xf32>
    %cst_89 = arith.constant 1.000000e+00 : f32
    %320 = vector.broadcast %cst_89 : f32 to vector<2x32xf32>
    %321 = arith.addf %320, %319 : vector<2x32xf32>
    %322 = arith.divf %320, %321 : vector<2x32xf32>
    %323 = vector.extract_strided_slice %316 {offsets = [0, 32], sizes = [2, 32], strides = [1, 1]} : vector<2x128xf32> to vector<2x32xf32>
    %324 = arith.negf %323 : vector<2x32xf32>
    %325 = math.exp %324 : vector<2x32xf32>
    %cst_90 = arith.constant 1.000000e+00 : f32
    %326 = vector.broadcast %cst_90 : f32 to vector<2x32xf32>
    %327 = arith.addf %326, %325 : vector<2x32xf32>
    %328 = arith.divf %326, %327 : vector<2x32xf32>
    %329 = vector.extract_strided_slice %316 {offsets = [0, 64], sizes = [2, 32], strides = [1, 1]} : vector<2x128xf32> to vector<2x32xf32>
    %330 = math.tanh %329 : vector<2x32xf32>
    %331 = vector.extract_strided_slice %316 {offsets = [0, 96], sizes = [2, 32], strides = [1, 1]} : vector<2x128xf32> to vector<2x32xf32>
    %332 = arith.negf %331 : vector<2x32xf32>
    %333 = math.exp %332 : vector<2x32xf32>
    %cst_91 = arith.constant 1.000000e+00 : f32
    %334 = vector.broadcast %cst_91 : f32 to vector<2x32xf32>
    %335 = arith.addf %334, %333 : vector<2x32xf32>
    %336 = arith.divf %334, %335 : vector<2x32xf32>
    %337 = arith.mulf %328, %280 : vector<2x32xf32>
    %338 = arith.mulf %322, %330 : vector<2x32xf32>
    %339 = arith.addf %337, %338 : vector<2x32xf32>
    %340 = math.tanh %339 : vector<2x32xf32>
    %341 = arith.mulf %336, %340 : vector<2x32xf32>
    %cst_92 = arith.constant dense<0.000000e+00> : vector<2x128xf32>
    %342 = tpu.matmul %341, %1, %cst_92 {dimension_numbers = #tpu.dot_dimension_numbers<[1], [0], [0], [1], [0, 0, 1, 1], [], []>} : vector<2x32xf32>, vector<32x128xf32>, vector<2x128xf32> -> vector<2x128xf32>
    %cst_93 = arith.constant dense<0.000000e+00> : vector<2x128xf32>
    %343 = tpu.matmul %312, %2, %cst_93 {dimension_numbers = #tpu.dot_dimension_numbers<[1], [0], [0], [1], [0, 0, 1, 1], [], []>} : vector<2x32xf32>, vector<32x128xf32>, vector<2x128xf32> -> vector<2x128xf32>
    %344 = arith.addf %342, %343 : vector<2x128xf32>
    %345 = vector.broadcast %3 : vector<1x128xf32> to vector<2x128xf32>
    %346 = arith.addf %344, %345 : vector<2x128xf32>
    %347 = vector.extract_strided_slice %346 {offsets = [0, 0], sizes = [2, 32], strides = [1, 1]} : vector<2x128xf32> to vector<2x32xf32>
    %348 = arith.negf %347 : vector<2x32xf32>
    %349 = math.exp %348 : vector<2x32xf32>
    %cst_94 = arith.constant 1.000000e+00 : f32
    %350 = vector.broadcast %cst_94 : f32 to vector<2x32xf32>
    %351 = arith.addf %350, %349 : vector<2x32xf32>
    %352 = arith.divf %350, %351 : vector<2x32xf32>
    %353 = vector.extract_strided_slice %346 {offsets = [0, 32], sizes = [2, 32], strides = [1, 1]} : vector<2x128xf32> to vector<2x32xf32>
    %354 = arith.negf %353 : vector<2x32xf32>
    %355 = math.exp %354 : vector<2x32xf32>
    %cst_95 = arith.constant 1.000000e+00 : f32
    %356 = vector.broadcast %cst_95 : f32 to vector<2x32xf32>
    %357 = arith.addf %356, %355 : vector<2x32xf32>
    %358 = arith.divf %356, %357 : vector<2x32xf32>
    %359 = vector.extract_strided_slice %346 {offsets = [0, 64], sizes = [2, 32], strides = [1, 1]} : vector<2x128xf32> to vector<2x32xf32>
    %360 = math.tanh %359 : vector<2x32xf32>
    %361 = vector.extract_strided_slice %346 {offsets = [0, 96], sizes = [2, 32], strides = [1, 1]} : vector<2x128xf32> to vector<2x32xf32>
    %362 = arith.negf %361 : vector<2x32xf32>
    %363 = math.exp %362 : vector<2x32xf32>
    %cst_96 = arith.constant 1.000000e+00 : f32
    %364 = vector.broadcast %cst_96 : f32 to vector<2x32xf32>
    %365 = arith.addf %364, %363 : vector<2x32xf32>
    %366 = arith.divf %364, %365 : vector<2x32xf32>
    %367 = arith.mulf %358, %310 : vector<2x32xf32>
    %368 = arith.mulf %352, %360 : vector<2x32xf32>
    %369 = arith.addf %367, %368 : vector<2x32xf32>
    %370 = math.tanh %369 : vector<2x32xf32>
    %371 = arith.mulf %366, %370 : vector<2x32xf32>
    %c10_97 = arith.constant 10 : index
    %c0_98 = arith.constant 0 : index
    %372 = vector.load %arg18[%c10_97, %c0_98] : memref<16x32xf32, #tpu.memory_space<vmem>>, vector<2x32xf32>
    tpu.vector_store %arg18[%c10_97, %c0_98], %371 {strides = array<i32>} : memref<16x32xf32, #tpu.memory_space<vmem>>, vector<2x32xf32>,
    %c12 = arith.constant 12 : index
    %c0_99 = arith.constant 0 : index
    %373 = vector.load %arg19[%c12, %c0_99] : memref<16x128xf32, #tpu.memory_space<vmem>>, vector<2x128xf32>
    %cst_100 = arith.constant dense<0.000000e+00> : vector<2x128xf32>
    %374 = tpu.matmul %341, %0, %cst_100 {dimension_numbers = #tpu.dot_dimension_numbers<[1], [0], [0], [1], [0, 0, 1, 1], [], []>} : vector<2x32xf32>, vector<32x128xf32>, vector<2x128xf32> -> vector<2x128xf32>
    %375 = arith.addf %373, %374 : vector<2x128xf32>
    %376 = vector.extract_strided_slice %375 {offsets = [0, 0], sizes = [2, 32], strides = [1, 1]} : vector<2x128xf32> to vector<2x32xf32>
    %377 = arith.negf %376 : vector<2x32xf32>
    %378 = math.exp %377 : vector<2x32xf32>
    %cst_101 = arith.constant 1.000000e+00 : f32
    %379 = vector.broadcast %cst_101 : f32 to vector<2x32xf32>
    %380 = arith.addf %379, %378 : vector<2x32xf32>
    %381 = arith.divf %379, %380 : vector<2x32xf32>
    %382 = vector.extract_strided_slice %375 {offsets = [0, 32], sizes = [2, 32], strides = [1, 1]} : vector<2x128xf32> to vector<2x32xf32>
    %383 = arith.negf %382 : vector<2x32xf32>
    %384 = math.exp %383 : vector<2x32xf32>
    %cst_102 = arith.constant 1.000000e+00 : f32
    %385 = vector.broadcast %cst_102 : f32 to vector<2x32xf32>
    %386 = arith.addf %385, %384 : vector<2x32xf32>
    %387 = arith.divf %385, %386 : vector<2x32xf32>
    %388 = vector.extract_strided_slice %375 {offsets = [0, 64], sizes = [2, 32], strides = [1, 1]} : vector<2x128xf32> to vector<2x32xf32>
    %389 = math.tanh %388 : vector<2x32xf32>
    %390 = vector.extract_strided_slice %375 {offsets = [0, 96], sizes = [2, 32], strides = [1, 1]} : vector<2x128xf32> to vector<2x32xf32>
    %391 = arith.negf %390 : vector<2x32xf32>
    %392 = math.exp %391 : vector<2x32xf32>
    %cst_103 = arith.constant 1.000000e+00 : f32
    %393 = vector.broadcast %cst_103 : f32 to vector<2x32xf32>
    %394 = arith.addf %393, %392 : vector<2x32xf32>
    %395 = arith.divf %393, %394 : vector<2x32xf32>
    %396 = arith.mulf %387, %339 : vector<2x32xf32>
    %397 = arith.mulf %381, %389 : vector<2x32xf32>
    %398 = arith.addf %396, %397 : vector<2x32xf32>
    %399 = math.tanh %398 : vector<2x32xf32>
    %400 = arith.mulf %395, %399 : vector<2x32xf32>
    %cst_104 = arith.constant dense<0.000000e+00> : vector<2x128xf32>
    %401 = tpu.matmul %400, %1, %cst_104 {dimension_numbers = #tpu.dot_dimension_numbers<[1], [0], [0], [1], [0, 0, 1, 1], [], []>} : vector<2x32xf32>, vector<32x128xf32>, vector<2x128xf32> -> vector<2x128xf32>
    %cst_105 = arith.constant dense<0.000000e+00> : vector<2x128xf32>
    %402 = tpu.matmul %371, %2, %cst_105 {dimension_numbers = #tpu.dot_dimension_numbers<[1], [0], [0], [1], [0, 0, 1, 1], [], []>} : vector<2x32xf32>, vector<32x128xf32>, vector<2x128xf32> -> vector<2x128xf32>
    %403 = arith.addf %401, %402 : vector<2x128xf32>
    %404 = vector.broadcast %3 : vector<1x128xf32> to vector<2x128xf32>
    %405 = arith.addf %403, %404 : vector<2x128xf32>
    %406 = vector.extract_strided_slice %405 {offsets = [0, 0], sizes = [2, 32], strides = [1, 1]} : vector<2x128xf32> to vector<2x32xf32>
    %407 = arith.negf %406 : vector<2x32xf32>
    %408 = math.exp %407 : vector<2x32xf32>
    %cst_106 = arith.constant 1.000000e+00 : f32
    %409 = vector.broadcast %cst_106 : f32 to vector<2x32xf32>
    %410 = arith.addf %409, %408 : vector<2x32xf32>
    %411 = arith.divf %409, %410 : vector<2x32xf32>
    %412 = vector.extract_strided_slice %405 {offsets = [0, 32], sizes = [2, 32], strides = [1, 1]} : vector<2x128xf32> to vector<2x32xf32>
    %413 = arith.negf %412 : vector<2x32xf32>
    %414 = math.exp %413 : vector<2x32xf32>
    %cst_107 = arith.constant 1.000000e+00 : f32
    %415 = vector.broadcast %cst_107 : f32 to vector<2x32xf32>
    %416 = arith.addf %415, %414 : vector<2x32xf32>
    %417 = arith.divf %415, %416 : vector<2x32xf32>
    %418 = vector.extract_strided_slice %405 {offsets = [0, 64], sizes = [2, 32], strides = [1, 1]} : vector<2x128xf32> to vector<2x32xf32>
    %419 = math.tanh %418 : vector<2x32xf32>
    %420 = vector.extract_strided_slice %405 {offsets = [0, 96], sizes = [2, 32], strides = [1, 1]} : vector<2x128xf32> to vector<2x32xf32>
    %421 = arith.negf %420 : vector<2x32xf32>
    %422 = math.exp %421 : vector<2x32xf32>
    %cst_108 = arith.constant 1.000000e+00 : f32
    %423 = vector.broadcast %cst_108 : f32 to vector<2x32xf32>
    %424 = arith.addf %423, %422 : vector<2x32xf32>
    %425 = arith.divf %423, %424 : vector<2x32xf32>
    %426 = arith.mulf %417, %369 : vector<2x32xf32>
    %427 = arith.mulf %411, %419 : vector<2x32xf32>
    %428 = arith.addf %426, %427 : vector<2x32xf32>
    %429 = math.tanh %428 : vector<2x32xf32>
    %430 = arith.mulf %425, %429 : vector<2x32xf32>
    %c12_109 = arith.constant 12 : index
    %c0_110 = arith.constant 0 : index
    %431 = vector.load %arg18[%c12_109, %c0_110] : memref<16x32xf32, #tpu.memory_space<vmem>>, vector<2x32xf32>
    tpu.vector_store %arg18[%c12_109, %c0_110], %430 {strides = array<i32>} : memref<16x32xf32, #tpu.memory_space<vmem>>, vector<2x32xf32>,
    %c14 = arith.constant 14 : index
    %c0_111 = arith.constant 0 : index
    %432 = vector.load %arg19[%c14, %c0_111] : memref<16x128xf32, #tpu.memory_space<vmem>>, vector<2x128xf32>
    %cst_112 = arith.constant dense<0.000000e+00> : vector<2x128xf32>
    %433 = tpu.matmul %400, %0, %cst_112 {dimension_numbers = #tpu.dot_dimension_numbers<[1], [0], [0], [1], [0, 0, 1, 1], [], []>} : vector<2x32xf32>, vector<32x128xf32>, vector<2x128xf32> -> vector<2x128xf32>
    %434 = arith.addf %432, %433 : vector<2x128xf32>
    %435 = vector.extract_strided_slice %434 {offsets = [0, 0], sizes = [2, 32], strides = [1, 1]} : vector<2x128xf32> to vector<2x32xf32>
    %436 = arith.negf %435 : vector<2x32xf32>
    %437 = math.exp %436 : vector<2x32xf32>
    %cst_113 = arith.constant 1.000000e+00 : f32
    %438 = vector.broadcast %cst_113 : f32 to vector<2x32xf32>
    %439 = arith.addf %438, %437 : vector<2x32xf32>
    %440 = arith.divf %438, %439 : vector<2x32xf32>
    %441 = vector.extract_strided_slice %434 {offsets = [0, 32], sizes = [2, 32], strides = [1, 1]} : vector<2x128xf32> to vector<2x32xf32>
    %442 = arith.negf %441 : vector<2x32xf32>
    %443 = math.exp %442 : vector<2x32xf32>
    %cst_114 = arith.constant 1.000000e+00 : f32
    %444 = vector.broadcast %cst_114 : f32 to vector<2x32xf32>
    %445 = arith.addf %444, %443 : vector<2x32xf32>
    %446 = arith.divf %444, %445 : vector<2x32xf32>
    %447 = vector.extract_strided_slice %434 {offsets = [0, 64], sizes = [2, 32], strides = [1, 1]} : vector<2x128xf32> to vector<2x32xf32>
    %448 = math.tanh %447 : vector<2x32xf32>
    %449 = vector.extract_strided_slice %434 {offsets = [0, 96], sizes = [2, 32], strides = [1, 1]} : vector<2x128xf32> to vector<2x32xf32>
    %450 = arith.negf %449 : vector<2x32xf32>
    %451 = math.exp %450 : vector<2x32xf32>
    %cst_115 = arith.constant 1.000000e+00 : f32
    %452 = vector.broadcast %cst_115 : f32 to vector<2x32xf32>
    %453 = arith.addf %452, %451 : vector<2x32xf32>
    %454 = arith.divf %452, %453 : vector<2x32xf32>
    %455 = arith.mulf %446, %398 : vector<2x32xf32>
    %456 = arith.mulf %440, %448 : vector<2x32xf32>
    %457 = arith.addf %455, %456 : vector<2x32xf32>
    %458 = math.tanh %457 : vector<2x32xf32>
    %459 = arith.mulf %454, %458 : vector<2x32xf32>
    %cst_116 = arith.constant dense<0.000000e+00> : vector<2x128xf32>
    %460 = tpu.matmul %459, %1, %cst_116 {dimension_numbers = #tpu.dot_dimension_numbers<[1], [0], [0], [1], [0, 0, 1, 1], [], []>} : vector<2x32xf32>, vector<32x128xf32>, vector<2x128xf32> -> vector<2x128xf32>
    %cst_117 = arith.constant dense<0.000000e+00> : vector<2x128xf32>
    %461 = tpu.matmul %430, %2, %cst_117 {dimension_numbers = #tpu.dot_dimension_numbers<[1], [0], [0], [1], [0, 0, 1, 1], [], []>} : vector<2x32xf32>, vector<32x128xf32>, vector<2x128xf32> -> vector<2x128xf32>
    %462 = arith.addf %460, %461 : vector<2x128xf32>
    %463 = vector.broadcast %3 : vector<1x128xf32> to vector<2x128xf32>
    %464 = arith.addf %462, %463 : vector<2x128xf32>
    %465 = vector.extract_strided_slice %464 {offsets = [0, 0], sizes = [2, 32], strides = [1, 1]} : vector<2x128xf32> to vector<2x32xf32>
    %466 = arith.negf %465 : vector<2x32xf32>
    %467 = math.exp %466 : vector<2x32xf32>
    %cst_118 = arith.constant 1.000000e+00 : f32
    %468 = vector.broadcast %cst_118 : f32 to vector<2x32xf32>
    %469 = arith.addf %468, %467 : vector<2x32xf32>
    %470 = arith.divf %468, %469 : vector<2x32xf32>
    %471 = vector.extract_strided_slice %464 {offsets = [0, 32], sizes = [2, 32], strides = [1, 1]} : vector<2x128xf32> to vector<2x32xf32>
    %472 = arith.negf %471 : vector<2x32xf32>
    %473 = math.exp %472 : vector<2x32xf32>
    %cst_119 = arith.constant 1.000000e+00 : f32
    %474 = vector.broadcast %cst_119 : f32 to vector<2x32xf32>
    %475 = arith.addf %474, %473 : vector<2x32xf32>
    %476 = arith.divf %474, %475 : vector<2x32xf32>
    %477 = vector.extract_strided_slice %464 {offsets = [0, 64], sizes = [2, 32], strides = [1, 1]} : vector<2x128xf32> to vector<2x32xf32>
    %478 = math.tanh %477 : vector<2x32xf32>
    %479 = vector.extract_strided_slice %464 {offsets = [0, 96], sizes = [2, 32], strides = [1, 1]} : vector<2x128xf32> to vector<2x32xf32>
    %480 = arith.negf %479 : vector<2x32xf32>
    %481 = math.exp %480 : vector<2x32xf32>
    %cst_120 = arith.constant 1.000000e+00 : f32
    %482 = vector.broadcast %cst_120 : f32 to vector<2x32xf32>
    %483 = arith.addf %482, %481 : vector<2x32xf32>
    %484 = arith.divf %482, %483 : vector<2x32xf32>
    %485 = arith.mulf %476, %428 : vector<2x32xf32>
    %486 = arith.mulf %470, %478 : vector<2x32xf32>
    %487 = arith.addf %485, %486 : vector<2x32xf32>
    %488 = math.tanh %487 : vector<2x32xf32>
    %489 = arith.mulf %484, %488 : vector<2x32xf32>
    %c14_121 = arith.constant 14 : index
    %c0_122 = arith.constant 0 : index
    %490 = vector.load %arg18[%c14_121, %c0_122] : memref<16x32xf32, #tpu.memory_space<vmem>>, vector<2x32xf32>
    tpu.vector_store %arg18[%c14_121, %c0_122], %489 {strides = array<i32>} : memref<16x32xf32, #tpu.memory_space<vmem>>, vector<2x32xf32>,
    %c0_123 = arith.constant 0 : index
    %c0_124 = arith.constant 0 : index
    %c0_125 = arith.constant 0 : index
    %491 = vector.load %arg16[%c0_123, %c0_124, %c0_125] : memref<2x2x32xf32, #tpu.memory_space<vmem>>, vector<1x2x32xf32>
    %492 = vector.shape_cast %491 : vector<1x2x32xf32> to vector<2x32xf32>
    %493 = vector.shape_cast %459 : vector<2x32xf32> to vector<1x2x32xf32>
    tpu.vector_store %arg16[%c0_123, %c0_124, %c0_125], %493 {strides = array<i32>} : memref<2x2x32xf32, #tpu.memory_space<vmem>>, vector<1x2x32xf32>,
    %c1_126 = arith.constant 1 : index
    %c0_127 = arith.constant 0 : index
    %c0_128 = arith.constant 0 : index
    %494 = vector.load %arg16[%c1_126, %c0_127, %c0_128] : memref<2x2x32xf32, #tpu.memory_space<vmem>>, vector<1x2x32xf32>
    %495 = vector.shape_cast %494 : vector<1x2x32xf32> to vector<2x32xf32>
    %496 = vector.shape_cast %489 : vector<2x32xf32> to vector<1x2x32xf32>
    tpu.vector_store %arg16[%c1_126, %c0_127, %c0_128], %496 {strides = array<i32>} : memref<2x2x32xf32, #tpu.memory_space<vmem>>, vector<1x2x32xf32>,
    %c0_129 = arith.constant 0 : index
    %c0_130 = arith.constant 0 : index
    %c0_131 = arith.constant 0 : index
    %497 = vector.load %arg17[%c0_129, %c0_130, %c0_131] : memref<2x2x32xf32, #tpu.memory_space<vmem>>, vector<1x2x32xf32>
    %498 = vector.shape_cast %497 : vector<1x2x32xf32> to vector<2x32xf32>
    %499 = vector.shape_cast %457 : vector<2x32xf32> to vector<1x2x32xf32>
    tpu.vector_store %arg17[%c0_129, %c0_130, %c0_131], %499 {strides = array<i32>} : memref<2x2x32xf32, #tpu.memory_space<vmem>>, vector<1x2x32xf32>,
    %c1_132 = arith.constant 1 : index
    %c0_133 = arith.constant 0 : index
    %c0_134 = arith.constant 0 : index
    %500 = vector.load %arg17[%c1_132, %c0_133, %c0_134] : memref<2x2x32xf32, #tpu.memory_space<vmem>>, vector<1x2x32xf32>
    %501 = vector.shape_cast %500 : vector<1x2x32xf32> to vector<2x32xf32>
    %502 = vector.shape_cast %487 : vector<2x32xf32> to vector<1x2x32xf32>
    tpu.vector_store %arg17[%c1_132, %c0_133, %c0_134], %502 {strides = array<i32>} : memref<2x2x32xf32, #tpu.memory_space<vmem>>, vector<1x2x32xf32>,
    %c0_135 = arith.constant 0 : index
    %c0_136 = arith.constant 0 : index
    %503 = vector.load %arg18[%c0_135, %c0_136] : memref<16x32xf32, #tpu.memory_space<vmem>>, vector<16x32xf32>
    %c0_137 = arith.constant 0 : index
    %c0_138 = arith.constant 0 : index
    %504 = vector.load %arg9[%c0_137, %c0_138] : memref<32x16xf32, #tpu.memory_space<vmem>>, vector<32x16xf32>
    %cst_139 = arith.constant dense<0.000000e+00> : vector<16x16xf32>
    %505 = tpu.matmul %503, %504, %cst_139 {dimension_numbers = #tpu.dot_dimension_numbers<[1], [0], [0], [1], [0, 0, 1, 1], [], []>} : vector<16x32xf32>, vector<32x16xf32>, vector<16x16xf32> -> vector<16x16xf32>
    %c0_140 = arith.constant 0 : index
    %c0_141 = arith.constant 0 : index
    %506 = vector.load %arg10[%c0_140, %c0_141] : memref<1x16xf32, #tpu.memory_space<vmem>>, vector<1x16xf32>
    %507 = vector.broadcast %506 : vector<1x16xf32> to vector<16x16xf32>
    %508 = arith.addf %505, %507 : vector<16x16xf32>
    %cst_142 = arith.constant dense<0.000000e+00> : vector<16xf32>
    %509 = vector.multi_reduction <add>, %508, %cst_142 [0] : vector<16x16xf32> to vector<16xf32>
    %510 = vector.shape_cast %509 : vector<16xf32> to vector<1x16xf32>
    %cst_143 = arith.constant 1.600000e+01 : f32
    %511 = vector.broadcast %cst_143 : f32 to vector<1x16xf32>
    %512 = arith.divf %510, %511 : vector<1x16xf32>
    %513 = vector.broadcast %512 : vector<1x16xf32> to vector<16x16xf32>
    %514 = arith.subf %508, %513 : vector<16x16xf32>
    %515 = arith.mulf %514, %514 : vector<16x16xf32>
    %cst_144 = arith.constant dense<0.000000e+00> : vector<16xf32>
    %516 = vector.multi_reduction <add>, %515, %cst_144 [0] : vector<16x16xf32> to vector<16xf32>
    %517 = vector.shape_cast %516 : vector<16xf32> to vector<1x16xf32>
    %cst_145 = arith.constant 1.600000e+01 : f32
    %518 = vector.broadcast %cst_145 : f32 to vector<1x16xf32>
    %519 = arith.divf %517, %518 : vector<1x16xf32>
    %cst_146 = arith.constant 9.99999974E-6 : f32
    %520 = vector.broadcast %cst_146 : f32 to vector<1x16xf32>
    %521 = arith.addf %519, %520 : vector<1x16xf32>
    %522 = math.rsqrt %521 : vector<1x16xf32>
    %523 = vector.broadcast %522 : vector<1x16xf32> to vector<16x16xf32>
    %524 = arith.mulf %514, %523 : vector<16x16xf32>
    %c0_147 = arith.constant 0 : index
    %c0_148 = arith.constant 0 : index
    %525 = vector.load %arg11[%c0_147, %c0_148] : memref<1x16xf32, #tpu.memory_space<vmem>>, vector<1x16xf32>
    %526 = vector.broadcast %525 : vector<1x16xf32> to vector<16x16xf32>
    %527 = arith.mulf %524, %526 : vector<16x16xf32>
    %c0_149 = arith.constant 0 : index
    %c0_150 = arith.constant 0 : index
    %528 = vector.load %arg12[%c0_149, %c0_150] : memref<1x16xf32, #tpu.memory_space<vmem>>, vector<1x16xf32>
    %529 = vector.broadcast %528 : vector<1x16xf32> to vector<16x16xf32>
    %530 = arith.addf %527, %529 : vector<16x16xf32>
    %cst_151 = arith.constant 0.000000e+00 : f32
    %531 = vector.broadcast %cst_151 : f32 to vector<16x16xf32>
    %532 = arith.maximumf %530, %531 : vector<16x16xf32>
    %c0_152 = arith.constant 0 : index
    %c0_153 = arith.constant 0 : index
    %533 = vector.load %arg13[%c0_152, %c0_153] : memref<16x128xf32, #tpu.memory_space<vmem>>, vector<16x128xf32>
    %cst_154 = arith.constant dense<0.000000e+00> : vector<16x128xf32>
    %534 = tpu.matmul %532, %533, %cst_154 {dimension_numbers = #tpu.dot_dimension_numbers<[1], [0], [0], [1], [0, 0, 1, 1], [], []>} : vector<16x16xf32>, vector<16x128xf32>, vector<16x128xf32> -> vector<16x128xf32>
    %c0_155 = arith.constant 0 : index
    %c0_156 = arith.constant 0 : index
    %535 = vector.load %arg14[%c0_155, %c0_156] : memref<1x128xf32, #tpu.memory_space<vmem>>, vector<1x128xf32>
    %536 = vector.broadcast %535 : vector<1x128xf32> to vector<16x128xf32>
    %537 = arith.addf %534, %536 : vector<16x128xf32>
    %c0_157 = arith.constant 0 : index
    %c0_158 = arith.constant 0 : index
    %538 = vector.load %arg15[%c0_157, %c0_158] : memref<16x128xf32, #tpu.memory_space<vmem>>, vector<16x128xf32>
    tpu.vector_store %arg15[%c0_157, %c0_158], %537 {strides = array<i32>} : memref<16x128xf32, #tpu.memory_space<vmem>>, vector<16x128xf32>,
    return
  }
}

</mosaic_0001>

<bundles_post_ra>
// kernel: net_forward.1
= control target key start
LH: loop header
LB: loop body
LE: loop exit
PB: predicated region body
PF: predicated region fallthrough
CT: control target
= control target key end

     0   :  { %s4134_s0 = inlined_call_operand.vmem [shape: f32[16,8], index: 0, kind: input, shape index: {}]   ;;  %s4135_s1 = inlined_call_operand.vmem [shape: f32[8,128], index: 1, kind: input, shape index: {}]   ;;  %s4136_s2 = inlined_call_operand.hbm [shape: f32[32,128], index: 2, kind: input, shape index: {}]   ;;  %s4137_s3 = inlined_call_operand.hbm [shape: f32[1,128], index: 3, kind: input, shape index: {}]   ;;  %s4138_s4 = inlined_call_operand.vmem [shape: f32[32,128], index: 4, kind: input, shape index: {}]   ;;  %s4139_s5 = inlined_call_operand.vmem [shape: f32[32,128], index: 5, kind: input, shape index: {}]   ;;  %s4140_s6 = inlined_call_operand.hbm [shape: f32[1,128], index: 6, kind: input, shape index: {}]   ;;  %s4141_s7 = inlined_call_operand.vmem [shape: f32[2,2,32], index: 7, kind: input, shape index: {}, may-alias: {7,8}]   ;;  %s4142_s8 = inlined_call_operand.vmem [shape: f32[2,2,32], index: 8, kind: input, shape index: {}, may-alias: {7,8}]   ;;  %s4143_s9 = inlined_call_operand.vmem [shape: f32[32,16], index: 9, kind: input, shape index: {}]   ;;  %s4144_s10 = inlined_call_operand.hbm [shape: f32[1,16], index: 10, kind: input, shape index: {}]   ;;  %s4145_s11 = inlined_call_operand.vmem [shape: f32[1,16], index: 11, kind: input, shape index: {}]   ;;  %s4146_s12 = inlined_call_operand.vmem [shape: f32[1,16], index: 12, kind: input, shape index: {}]   ;;  %s4147_s13 = inlined_call_operand.vmem [shape: f32[16,128], index: 13, kind: input, shape index: {}]   ;;  %s4148_s14 = inlined_call_operand.vmem [shape: f32[1,128], index: 14, kind: input, shape index: {}]   ;;  %s4149_s15 = inlined_call_operand.vmem [shape: f32[16,128], index: 15, kind: output, shape index: {0}]   ;;  %s4150_s16 = inlined_call_operand.hbm [shape: f32[2,2,32], index: 16, kind: output, shape index: {1}]   ;;  %s4151_s17 = inlined_call_operand.hbm [shape: f32[2,2,32], index: 17, kind: output, shape index: {2}]  }
   0x1   :  { %4153 = sst [smem:[#allocation20_spill]] %s4134_s0 }
   0x2   :  { %4154 = sst [smem:[#allocation21_spill]] %s4135_s1 }
   0x3   :  { %23 = vsyncpa [#allocation5], 0 }
   0x4   :  { %24 = vsyncpa [#allocation8], 0 }
   0x5   :  { %25 = vsyncpa [#allocation11], 0 }
   0x6   :  { %26 = vsyncpa [#allocation6], 0 }
   0x7   :  { %27 = vsyncpa [#allocation14], 0  ;;  %s3472_s24 = smov [#allocation7]   ;;  %s3473_s26 = smov [#allocation4]  }
   0x8   :  { %s50_s25 = sshll.u32 %s3472_s24, 4  ;;  %s37_s27 = sshll.u32 %s3473_s26, 4  ;;  %s51_s25 = int_to_ptr.vmem [resolvable:$true] %s50_s25  ;;  %s38_s27 = int_to_ptr.vmem [resolvable:$true] %s37_s27 }
   0x9   :  { %s3350_s28 = scalar_lea.vmem %s51_s25, 16  ;;  %s3354_s29 = scalar_lea.vmem %s51_s25, 32 }
   0xa   :  { %p3351_p0 = scmp.ne.s32.totalorder %s51_s25, %s3350_s28  ;;  %p3355_p1 = scmp.lt.s32.totalorder %s51_s25, %s51_s25 }
   0xb   :  { %p3356_p2 = scmp.lt.s32.totalorder %s3354_s29, %s3350_s28 }
   0xd   :  { %p3357_p3 = por %p3356_p2, %p3355_p1 }
   0xf   :  { %p3358_p4 = pnand %p3357_p3, %p3351_p0 }
  0x11   :  { %3361 = shalt.err (!%p3358_p4)
}
  0x12   :  { %53 = dma.hbm_to_vmem [thread:$0]  %s4137_s3, 16, %s51_s25, [#allocation8]  }
  0x13   :  { %s3370_s18 = scalar_lea.vmem %s38_s27, 512  ;;  %p3375_p6 = scmp.lt.s32.totalorder %s38_s27, %s38_s27 }
  0x14   :  { %p3371_p5 = scmp.ne.s32.totalorder %s38_s27, %s3370_s18  ;;  %p3376_p7 = scmp.lt.s32.totalorder %s3370_s18, %s3370_s18 }
  0x16   :  { %p3377_p8 = por %p3376_p7, %p3375_p6 }
  0x18   :  { %p3378_p9 = pnand %p3377_p8, %p3371_p5 }
  0x1a   :  { %3381 = shalt.err (!%p3378_p9)
}
  0x1b   :  { %s3474_s19 = smov 128   ;;  %s3475_s1 = smov 8  }
  0x1c   :  { %43 = dma.hbm_to_vmem [thread:$0]  %s4136_s2, 512, %s38_s27, [#allocation5], %s3474_s19, %s3474_s19, %s3475_s1  }
  0x1d   :  { %s3476_s22 = smov [#allocation9]   ;;  %s3477_s24 = smov [#allocation10]  }
  0x1e   :  { %s64_s23 = sshll.u32 %s3476_s22, 4  ;;  %s80_s26 = sshll.u32 %s3477_s24, 4  ;;  %s65_s23 = int_to_ptr.vmem [resolvable:$true] %s64_s23  ;;  %s81_s26 = int_to_ptr.vmem [resolvable:$true] %s80_s26 }
  0x1f   :  { %s3390_s3 = scalar_lea.vmem %s65_s23, 16  ;;  %s3394_s25 = scalar_lea.vmem %s65_s23, 32 }
  0x20   :  { %p3391_p10 = scmp.ne.s32.totalorder %s65_s23, %s3390_s3  ;;  %p3395_p11 = scmp.lt.s32.totalorder %s65_s23, %s65_s23 }
  0x21   :  { %p3396_p12 = scmp.lt.s32.totalorder %s3394_s25, %s3390_s3 }
  0x23   :  { %p3397_p13 = por %p3396_p12, %p3395_p11 }
  0x25   :  { %p3398_p0 = pnand %p3397_p13, %p3391_p10 }
  0x27   :  { %3401 = shalt.err (!%p3398_p0)
}
  0x28   :  { %67 = dma.hbm_to_vmem [thread:$0]  %s4140_s6, 16, %s65_s23, [#allocation8]  }
  0x29   :  { %s3410_s0 = scalar_lea.vmem %s81_s26, 16  ;;  %s3414_s2 = scalar_lea.vmem %s81_s26, 32 }
  0x2a   :  { %p3411_p1 = scmp.ne.s32.totalorder %s81_s26, %s3410_s0  ;;  %p3415_p2 = scmp.lt.s32.totalorder %s81_s26, %s81_s26 }
  0x2b   :  { %p3416_p3 = scmp.lt.s32.totalorder %s3414_s2, %s3410_s0 }
  0x2d   :  { %p3417_p4 = por %p3416_p3, %p3415_p2 }
  0x2f   :  { %p3418_p5 = pnand %p3417_p4, %p3411_p1 }
  0x31   :  { %3421 = shalt.err (!%p3418_p5)
}
  0x32   :  { %83 = dma.hbm_to_vmem [thread:$0]  %s4144_s10, 16, %s81_s26, [#allocation11]  }
  0x33   :  { %3462 = dma.done.wait [#allocation5], 512  }
  0x34   :  { %3463 = vsyncadd [#allocation5], 4294966784 }
  0x35   :  { %3464 = dma.done.wait [#allocation8], 32  }
  0x36   :  { %3465 = vsyncadd [#allocation8], 4294967264 }
  0x37   :  { %3466 = dma.done.wait [#allocation11], 16  }
  0x38   :  { %3467 = vsyncadd [#allocation11], 4294967280  ;;  %v3478_v0 = vmov 0.0   ;;  %vm3479_vm0 = vmmov 0   ;;  %vm127_vm1 = vcmask 64512   ;;  %s4155_s19 = sld [smem:[#allocation21_spill]] }
  0x39   :  { %2903 = vmatprep.subr.mxu1 %v3478_v0  ;;  %2911 = vmatprep.mubr.msk.f32.mxu1 %vm3479_vm0, %v3478_v0  ;;  %s4156_s20 = sld [smem:[#allocation20_spill]]  ;;  %v3600_v4 = vld [vmem:[#allocation4 + $0x18] sm:$0xff]  ;;  %v3602_v5 = vld [vmem:[#allocation4 + $0x10] sm:$0xff]  ;;  %v3606_v6 = vld [vmem:[#allocation4 + $0x8] sm:$0xff]  ;;  %vm218_vm2 = vcmask 261120   ;;  %s3480_s26 = smov 64  }
  0x3a   :  { %2904 = vmatpush3.msra.mxu1 %v3600_v4  ;;  %v3611_v7 = vld [vmem:[#allocation4] sm:$0xff]  ;;  %s3481_s28 = smov 32   ;;  %v3637_v30 = vld [vmem:[%s4139_s5 + $0x18] sm:$0xff]  ;;  %v3642_v31 = vld [vmem:[%s4139_s5 + $0x10] sm:$0xff]  ;;  %vm508_vm3 = vcmask 254976   ;;  %vm2530_vm4 = vcmask 130048  }
  0x3b   :  { %2905 = vmatprep.subr.mxu1 %v3478_v0  ;;  %v211_v8 = vld [vmem:[%s4141_s7] sm:$0x3]  ;;  %v3648_v32 = vld [vmem:[%s4138_s4 + $0x18] sm:$0xff]  ;;  %v3654_v33 = vld [vmem:[%s4139_s5 + $0x8] sm:$0xff]  ;;  %s3484_s22 = smov [#allocation13]  }
  0x3c   :  { %2906 = vmatpush3.msra.mxu1 %v3602_v5  ;;  %v2711_v9 = vld [vmem:[#allocation7] ss:$0 sm:$0xff]  ;;  %v3660_v34 = vld [vmem:[%s4138_s4 + $0x10] sm:$0xff]  ;;  %v3667_v35 = vld [vmem:[%s4138_s4 + $0x8] sm:$0xff] }
  0x3d   :  { %2907 = vmatprep.subr.mxu1 %v3478_v0  ;;  %v212_v19 = vld [vmem:[%s4142_s8] sm:$0x3]  ;;  %v2714_v37 = vld [vmem:[%s4141_s7 + $0x2] sm:$0x3] }
  0x3e   :  { %v119_v1 = vld [vmem:[%s4155_s19] sm:$0xff]  ;;  %2908 = vmatpush3.msra.mxu1 %v3606_v6 }
  0x3f   :  { %v117_v2 = vld [vmem:[%s4156_s20] sm:$0xff]  ;;  %v118_v3 = vld [vmem:[%s4156_s20 + $0x8] sm:$0xff]  ;;  %2898 = vmatprep.subr.mxu0 %v119_v1  ;;  %2909 = vmatprep.subr.mxu1 %v3478_v0  ;;  %s3483_s20 = smov [#allocation12]  }
  0x40   :  { %2900 = vmatprep.mubr.msk.f32.mxu0 %vm127_vm1, %v117_v2  ;;  %2899 = vmatpush3.msra.mxu0 %v119_v1  ;;  %v3673_v36 = vld [vmem:[%s4139_s5] sm:$0xff]  ;;  %s2679_s21 = sshll.u32 %s3483_s20, 4  ;;  %s2680_s21 = int_to_ptr.vmem [resolvable:$true] %s2679_s21 }
  0x41   :  { %2901 = vmatmul.mubr.msk.f32.vlgmr.msra.gmra.mxu0 %vm127_vm1, %v118_v3  ;;  %2914 = vmatprep.subr.mxu0 %v3478_v0  ;;  %v3686_v38 = vld [vmem:[%s4138_s4] sm:$0xff]  ;;  %s3422_s23 = scalar_lea.vmem %s2680_s21, 64  ;;  %p3427_p7 = scmp.lt.s32.totalorder %s2680_s21, %s2680_s21 }
  0x42   :  { %2922 = vmatprep.mubr.msk.f32.mxu0 %vm3479_vm0, %v3478_v0  ;;  %2910 = vmatpush3.msra.mxu1 %v3611_v7  ;;  %v3728_v45 = vld [vmem:[#allocation9] ss:$0 sm:$0xff]  ;;  %p3423_p6 = scmp.ne.s32.totalorder %s2680_s21, %s3422_s23  ;;  %p3428_p8 = scmp.lt.s32.totalorder %s3422_s23, %s3422_s23 }
  0x43   :  { %2912 = vmatmul.mubr.msk.f32.vlgmr.msra.gmra.mxu1 %vm218_vm2, %v211_v8  ;;  %2925 = vmatprep.subr.mxu1 %v3478_v0  ;;  %v2715_v56 = vld [vmem:[%s4142_s8 + $0x2] sm:$0x3] }
  0x44   :  { %2933 = vmatprep.mubr.msk.f32.mxu1 %vm3479_vm0, %v3478_v0  ;;  %2915 = vmatpush3.msra.mxu0 %v3637_v30  ;;  %p3429_p9 = por %p3428_p8, %p3427_p7 }
  0x45   :  { %2916 = vmatprep.subr.mxu0 %v3478_v0  ;;  %2926 = vmatpush3.msra.mxu1 %v3648_v32 }
  0x46   :  { %2917 = vmatpush3.msra.mxu0 %v3642_v31  ;;  %2927 = vmatprep.subr.mxu1 %v3478_v0  ;;  %p3430_p10 = pnand %p3429_p9, %p3423_p6 }
  0x47   :  { %2918 = vmatprep.subr.mxu0 %v3478_v0  ;;  %2928 = vmatpush3.msra.mxu1 %v3660_v34 }
  0x48   :  { %2919 = vmatpush3.msra.mxu0 %v3654_v33  ;;  %2929 = vmatprep.subr.mxu1 %v3478_v0 }
  0x49   :  { %2920 = vmatprep.subr.mxu0 %v3478_v0  ;;  %2930 = vmatpush3.msra.mxu1 %v3667_v35 }
  0x4a   :  { %2921 = vmatpush3.msra.mxu0 %v3673_v36  ;;  %2931 = vmatprep.subr.mxu1 %v3478_v0 }
  0x4b   :  { %2936 = vmatprep.subr.mxu0 %v3478_v0  ;;  %2923 = vmatmul.mubr.msk.f32.vlgmr.msra.gmra.mxu0 %vm218_vm2, %v2714_v37 }
  0x4c   :  { %2937 = vmatpush3.msra.mxu0 %v3600_v4  ;;  %2932 = vmatpush3.msra.mxu1 %v3686_v38 }
  0x4d   :  { %2938 = vmatprep.subr.mxu0 %v3478_v0  ;;  %2944 = vmatprep.mubr.msk.f32.mxu0 %vm3479_vm0, %v3478_v0 }
  0x4e   :  { %2939 = vmatpush3.msra.mxu0 %v3602_v5  ;;  %2947 = vmatprep.subr.mxu1 %v3478_v0 }
  0x4f   :  { %2940 = vmatprep.subr.mxu0 %v3478_v0 }
  0x50   :  { %2941 = vmatpush3.msra.mxu0 %v3606_v6 }
  0x51   :  { %2942 = vmatprep.subr.mxu0 %v3478_v0 }
  0x52   :  { %2943 = vmatpush3.msra.mxu0 %v3611_v7 }
  0x53   :  { %2958 = vmatprep.subr.mxu0 %v3478_v0 }
 0x101   :  { %v2902_v10 = vpop.f32.mrf.mxu0 }
 0x102   :  { %v206_v11 = vadd.f32 %v2902_v10, %v2711_v9 }
 0x103   :  { %v200_v12 = vpop.f32.mrf.mxu0  ;;  %v288_v14 = vpop.f32.mrf.mxu1 }
 0x104   :  { %210 = vst [vmem:[#allocation3 + $0x8] sm:$0xff] %v206_v11  ;;  %v201_v13 = vadd.f32 %v2711_v9, %v200_v12 }
 0x105   :  { %v2913_v15 = vpop.f32.mrf.mxu1 }
 0x106   :  { %209 = vst [vmem:[#allocation3] sm:$0xff] %v201_v13 }
 0x10b   :  { %v390_v42 = vpop.f32.mrf.mxu0 }
 0x10d   :  { %v217_v16 = vld [vmem:[#allocation3] sm:$0x3]  ;;  %v2924_v43 = vpop.f32.mrf.mxu0  ;;  %v510_v47 = vld [vmem:[#allocation3 + $0x2] sm:$0x3] }
 0x10e   :  { %v292_v17 = vadd.f32 %v288_v14, %v217_v16 }
 0x110   :  { %3199 = vtanh.f32 %v292_v17  ;;  %v2717_v20 = vmul.f32 -1.442695, %v292_v17 }
 0x112   :  { %3201 = vpow2.f32 %v2717_v20 }
 0x11d   :  { %v3200_v18 = vpop.eup %3199 }
 0x11e   :  { %306 = vrot.lane.b32.xlu0 %v3200_v18, %s3480_s26 }
 0x11f   :  { %v3202_v21 = vpop.eup %3201 }
 0x120   :  { %v296_v22 = vadd.f32 1.0, %v3202_v21 }
 0x122   :  { %301 = vrot.lane.b32.xlu0 %v212_v19, %s3481_s28  ;;  %3203 = vrcp.f32 %v296_v22 }
 0x12f   :  { %v3204_v23 = vpop.eup %3203 }
 0x190   :  { %v307_v24 = vpop.permute.xlu0 %306 }
 0x191   :  { %v309_v25 = vmul.f32 %v3204_v23, %v307_v24 }
 0x193   :  { %311 = vrot.lane.b32.xlu1 %v309_v25, %s3481_s28 }
 0x194   :  { %v302_v26 = vpop.permute.xlu0 %301 }
 0x195   :  { %v304_v27 = vmul.f32 %v3204_v23, %v302_v26 }
 0x205   :  { %v312_v28 = vpop.permute.xlu1 %311 }
 0x206   :  { %v3631_v29 = vadd.f32 %v312_v28, %v304_v27 }
 0x208   :  { %3205 = vtanh.f32 %v3631_v29 }
 0x215   :  { %v3206_v39 = vpop.eup %3205 }
 0x216   :  { %317 = vrot.lane.b32.xlu1 %v3206_v39, %s3480_s26  ;;  %v783_v39 = vld [vmem:[#allocation3 + $0x4] sm:$0x3] }
 0x288   :  { %v318_v40 = vpop.permute.xlu1 %317 }
 0x289   :  { %v320_v41 = vmul.f32 %v3204_v23, %v318_v40 }
 0x28b   :  { %395 = vrot.lane.b32.xlu0 %v320_v41, %s3481_s28 }
 0x2fd   :  { %v396_v44 = vpop.permute.xlu0 %395 }
 0x2fe   :  { %2934 = vmatmul.mubr.msk.f32.vlgmr.msra.gmra.mxu1 %vm218_vm2, %v396_v44  ;;  %2945 = vmatmul.mubr.msk.f32.vlgmr.msra.gmra.mxu0 %vm218_vm2, %v396_v44 }
 0x2ff   :  { %2959 = vmatpush3.msra.mxu0 %v3648_v32  ;;  %2948 = vmatpush3.msra.mxu1 %v3637_v30 }
 0x300   :  { %2960 = vmatprep.subr.mxu0 %v3478_v0  ;;  %2949 = vmatprep.subr.mxu1 %v3478_v0 }
 0x301   :  { %2961 = vmatpush3.msra.mxu0 %v3660_v34  ;;  %2950 = vmatpush3.msra.mxu1 %v3642_v31 }
 0x302   :  { %2962 = vmatprep.subr.mxu0 %v3478_v0  ;;  %2951 = vmatprep.subr.mxu1 %v3478_v0 }
 0x303   :  { %2963 = vmatpush3.msra.mxu0 %v3667_v35  ;;  %2952 = vmatpush3.msra.mxu1 %v3654_v33 }
 0x304   :  { %2964 = vmatprep.subr.mxu0 %v3478_v0  ;;  %2953 = vmatprep.subr.mxu1 %v3478_v0 }
 0x305   :  { %2965 = vmatpush3.msra.mxu0 %v3686_v38  ;;  %2966 = vmatprep.mubr.msk.f32.mxu0 %vm3479_vm0, %v3478_v0 }
 0x306   :  { %2954 = vmatpush3.msra.mxu1 %v3673_v36  ;;  %2955 = vmatprep.mubr.msk.f32.mxu1 %vm3479_vm0, %v3478_v0 }
 0x307   :  { %2969 = vmatprep.subr.mxu1 %v3478_v0  ;;  %2980 = vmatprep.subr.mxu0 %v3478_v0 }
 0x3be   :  { %v465_v46 = vpop.f32.mrf.mxu1  ;;  %v577_v48 = vpop.f32.mrf.mxu0 }
 0x3bf   :  { %v466_v49 = vadd.f32 %v465_v46, %v390_v42  ;;  %v581_v50 = vadd.f32 %v577_v48, %v510_v47 }
 0x3c0   :  { %v2935_v51 = vpop.f32.mrf.mxu1  ;;  %v2946_v52 = vpop.f32.mrf.mxu0 }
 0x3c1   :  { %v475_v53 = vadd.f32 %v3728_v45, %v466_v49  ;;  %3207 = vtanh.f32 %v581_v50  ;;  %v2723_v57 = vmul.f32 -1.442695, %v581_v50 }
 0x3c3   :  { %3209 = vtanh.f32 %v475_v53  ;;  %v2721_v58 = vmul.f32 -1.442695, %v475_v53 }
 0x3c4   :  { %3211 = vpow2.f32 %v2723_v57 }
 0x3c5   :  { %3213 = vpow2.f32 %v2721_v58 }
 0x3ce   :  { %v3208_v54 = vpop.eup %3207 }
 0x3cf   :  { %591 = vrot.lane.b32.xlu0 %v3208_v54, %s3480_s26 }
 0x3d0   :  { %v3210_v55 = vpop.eup %3209 }
 0x3d1   :  { %489 = vrot.lane.b32.xlu1 %v3210_v55, %s3480_s26  ;;  %v3212_v59 = vpop.eup %3211 }
 0x3d2   :  { %v3214_v60 = vpop.eup %3213  ;;  %v585_v61 = vadd.f32 1.0, %v3212_v59 }
 0x3d3   :  { %v479_v62 = vadd.f32 1.0, %v3214_v60 }
 0x3d4   :  { %3215 = vrcp.f32 %v585_v61 }
 0x3d5   :  { %484 = vrot.lane.b32.xlu1 %v2715_v56, %s3481_s28  ;;  %3217 = vrcp.f32 %v479_v62 }
 0x3e1   :  { %v3216_v63 = vpop.eup %3215 }
 0x3e2   :  { %v3218_v3 = vpop.eup %3217  ;;  %v589_v11 = vmul.f32 %v3216_v63, %v3631_v29 }
 0x441   :  { %v592_v1 = vpop.permute.xlu0 %591 }
 0x442   :  { %v594_v2 = vmul.f32 %v3216_v63, %v592_v1 }
 0x443   :  { %v490_v8 = vpop.permute.xlu1 %489 }
 0x444   :  { %v492_v9 = vmul.f32 %v3218_v3, %v490_v8  ;;  %596 = vrot.lane.b32.xlu1 %v594_v2, %s3481_s28 }
 0x446   :  { %494 = vrot.lane.b32.xlu0 %v492_v9, %s3481_s28 }
 0x447   :  { %v485_v10 = vpop.permute.xlu1 %484 }
 0x448   :  { %v487_v13 = vmul.f32 %v3218_v3, %v485_v10 }
 0x4b6   :  { %v597_v12 = vpop.permute.xlu1 %596 }
 0x4b7   :  { %v3740_v14 = vadd.f32 %v597_v12, %v589_v11 }
 0x4b8   :  { %v495_v15 = vpop.permute.xlu0 %494 }
 0x4b9   :  { %3219 = vtanh.f32 %v3740_v14  ;;  %v3743_v16 = vadd.f32 %v495_v15, %v487_v13 }
 0x4bb   :  { %3221 = vtanh.f32 %v3743_v16 }
 0x4c6   :  { %v3220_v17 = vpop.eup %3219 }
 0x4c7   :  { %602 = vrot.lane.b32.xlu1 %v3220_v17, %s3480_s26 }
 0x4c8   :  { %v3222_v18 = vpop.eup %3221 }
 0x4c9   :  { %500 = vrot.lane.b32.xlu0 %v3222_v18, %s3480_s26  ;;  %v1056_v18 = vld [vmem:[#allocation3 + $0x6] sm:$0x3] }
 0x539   :  { %v603_v19 = vpop.permute.xlu1 %602 }
 0x53a   :  { %v605_v20 = vmul.f32 %v3216_v63, %v603_v19 }
 0x53b   :  { %v501_v21 = vpop.permute.xlu0 %500 }
 0x53c   :  { %v503_v22 = vmul.f32 %v3218_v3, %v501_v21  ;;  %679 = vrot.lane.b32.xlu1 %v605_v20, %s3481_s28 }
 0x53e   :  { %505 = vrot.lane.b32.xlu0 %v503_v22, %s3481_s28 }
 0x5ae   :  { %v680_v23 = vpop.permute.xlu1 %679 }
 0x5af   :  { %2967 = vmatmul.mubr.msk.f32.vlgmr.msra.gmra.mxu0 %vm218_vm2, %v680_v23 }
 0x5b0   :  { %v506_v24 = vpop.permute.xlu0 %505  ;;  %2981 = vmatpush3.msra.mxu0 %v3637_v30  ;;  %2988 = vmatprep.mubr.msk.f32.mxu0 %vm3479_vm0, %v3478_v0 }
 0x5b1   :  { %509 = vst.msk [vmem:[#allocation2] sm:$0x3] %vm508_vm3, %v506_v24  ;;  %2956 = vmatmul.mubr.msk.f32.vlgmr.msra.gmra.mxu1 %vm218_vm2, %v506_v24  ;;  %2982 = vmatprep.subr.mxu0 %v3478_v0 }
 0x5b2   :  { %2970 = vmatpush3.msra.mxu1 %v3600_v4  ;;  %2977 = vmatprep.mubr.msk.f32.mxu1 %vm3479_vm0, %v3478_v0 }
 0x5b3   :  { %2971 = vmatprep.subr.mxu1 %v3478_v0  ;;  %2983 = vmatpush3.msra.mxu0 %v3642_v31 }
 0x5b4   :  { %2972 = vmatpush3.msra.mxu1 %v3602_v5  ;;  %2984 = vmatprep.subr.mxu0 %v3478_v0 }
 0x5b5   :  { %2973 = vmatprep.subr.mxu1 %v3478_v0  ;;  %2985 = vmatpush3.msra.mxu0 %v3654_v33 }
 0x5b6   :  { %2974 = vmatpush3.msra.mxu1 %v3606_v6  ;;  %2986 = vmatprep.subr.mxu0 %v3478_v0 }
 0x5b7   :  { %2975 = vmatprep.subr.mxu1 %v3478_v0  ;;  %2987 = vmatpush3.msra.mxu0 %v3673_v36 }
 0x5b8   :  { %2976 = vmatpush3.msra.mxu1 %v3611_v7  ;;  %3002 = vmatprep.subr.mxu0 %v3478_v0 }
 0x5b9   :  { %2978 = vmatmul.mubr.msk.f32.vlgmr.msra.gmra.mxu1 %vm218_vm2, %v680_v23  ;;  %2991 = vmatprep.subr.mxu1 %v3478_v0 }
 0x5ba   :  { %2992 = vmatpush3.msra.mxu1 %v3648_v32  ;;  %2999 = vmatprep.mubr.msk.f32.mxu1 %vm3479_vm0, %v3478_v0 }
 0x5bb   :  { %2993 = vmatprep.subr.mxu1 %v3478_v0 }
 0x5bc   :  { %2994 = vmatpush3.msra.mxu1 %v3660_v34 }
 0x5bd   :  { %2995 = vmatprep.subr.mxu1 %v3478_v0 }
 0x5be   :  { %2996 = vmatpush3.msra.mxu1 %v3667_v35 }
 0x5bf   :  { %2997 = vmatprep.subr.mxu1 %v3478_v0 }
 0x5c0   :  { %2998 = vmatpush3.msra.mxu1 %v3686_v38 }
 0x5c1   :  { %3013 = vmatprep.subr.mxu1 %v3478_v0 }
 0x66f   :  { %v749_v25 = vpop.f32.mrf.mxu0 }
 0x671   :  { %v674_v26 = vpop.f32.mrf.mxu1  ;;  %v2968_v27 = vpop.f32.mrf.mxu0 }
 0x672   :  { %v750_v28 = vadd.f32 %v749_v25, %v674_v26 }
 0x673   :  { %v2957_v29 = vpop.f32.mrf.mxu1 }
 0x674   :  { %v753_v37 = vadd.f32 %v3728_v45, %v750_v28 }
 0x676   :  { %3223 = vtanh.f32 %v753_v37  ;;  %v2726_v46 = vmul.f32 -1.442695, %v753_v37 }
 0x679   :  { %v850_v40 = vpop.f32.mrf.mxu1 }
 0x67a   :  { %v854_v41 = vadd.f32 %v850_v40, %v783_v39 }
 0x67b   :  { %v2979_v42 = vpop.f32.mrf.mxu1 }
 0x67c   :  { %3225 = vtanh.f32 %v854_v41  ;;  %v2728_v47 = vmul.f32 -1.442695, %v854_v41 }
 0x67d   :  { %3227 = vpow2.f32 %v2726_v46 }
 0x67e   :  { %3229 = vpow2.f32 %v2728_v47 }
 0x683   :  { %v3224_v43 = vpop.eup %3223 }
 0x684   :  { %763 = vrot.lane.b32.xlu0 %v3224_v43, %s3480_s26 }
 0x689   :  { %v3226_v44 = vpop.eup %3225 }
 0x68a   :  { %864 = vrot.lane.b32.xlu1 %v3226_v44, %s3480_s26  ;;  %v3228_v48 = vpop.eup %3227 }
 0x68b   :  { %v757_v49 = vadd.f32 1.0, %v3228_v48  ;;  %v3230_v50 = vpop.eup %3229 }
 0x68c   :  { %v858_v51 = vadd.f32 1.0, %v3230_v50 }
 0x68d   :  { %3231 = vrcp.f32 %v757_v49 }
 0x68e   :  { %3233 = vrcp.f32 %v858_v51 }
 0x69a   :  { %v3232_v52 = vpop.eup %3231 }
 0x69b   :  { %v3234_v55 = vpop.eup %3233  ;;  %v761_v58 = vmul.f32 %v3232_v52, %v3743_v16 }
 0x69c   :  { %v862_v61 = vmul.f32 %v3234_v55, %v3740_v14 }
 0x6f6   :  { %v764_v53 = vpop.permute.xlu0 %763 }
 0x6f7   :  { %v766_v54 = vmul.f32 %v3232_v52, %v764_v53 }
 0x6f9   :  { %768 = vrot.lane.b32.xlu0 %v766_v54, %s3481_s28 }
 0x6fc   :  { %v865_v56 = vpop.permute.xlu1 %864 }
 0x6fd   :  { %v867_v57 = vmul.f32 %v3234_v55, %v865_v56 }
 0x6ff   :  { %869 = vrot.lane.b32.xlu1 %v867_v57, %s3481_s28 }
 0x76b   :  { %v769_v59 = vpop.permute.xlu0 %768 }
 0x76c   :  { %v3790_v60 = vadd.f32 %v769_v59, %v761_v58 }
 0x76e   :  { %3235 = vtanh.f32 %v3790_v60 }
 0x771   :  { %v870_v62 = vpop.permute.xlu1 %869 }
 0x772   :  { %v3794_v63 = vadd.f32 %v870_v62, %v862_v61 }
 0x774   :  { %3237 = vtanh.f32 %v3794_v63 }
 0x77b   :  { %v3236_v1 = vpop.eup %3235 }
 0x77c   :  { %774 = vrot.lane.b32.xlu0 %v3236_v1, %s3480_s26 }
 0x781   :  { %v3238_v2 = vpop.eup %3237 }
 0x782   :  { %875 = vrot.lane.b32.xlu1 %v3238_v2, %s3480_s26 }
 0x7ee   :  { %v775_v3 = vpop.permute.xlu0 %774 }
 0x7ef   :  { %v777_v8 = vmul.f32 %v3232_v52, %v775_v3  ;;  %v1329_v3 = vld [vmem:[#allocation3 + $0x8] sm:$0x3] }
 0x7f1   :  { %779 = vrot.lane.b32.xlu0 %v777_v8, %s3481_s28 }
 0x7f4   :  { %v876_v9 = vpop.permute.xlu1 %875 }
 0x7f5   :  { %v878_v10 = vmul.f32 %v3234_v55, %v876_v9 }
 0x7f7   :  { %952 = vrot.lane.b32.xlu1 %v878_v10, %s3481_s28 }
 0x863   :  { %v780_v11 = vpop.permute.xlu0 %779 }
 0x864   :  { %782 = vst.msk [vmem:[#allocation2 + $0x2] sm:$0x3] %vm508_vm3, %v780_v11  ;;  %2989 = vmatmul.mubr.msk.f32.vlgmr.msra.gmra.mxu0 %vm218_vm2, %v780_v11 }
 0x865   :  { %3003 = vmatpush3.msra.mxu0 %v3600_v4  ;;  %3010 = vmatprep.mubr.msk.f32.mxu0 %vm3479_vm0, %v3478_v0 }
 0x866   :  { %3004 = vmatprep.subr.mxu0 %v3478_v0 }
 0x867   :  { %3005 = vmatpush3.msra.mxu0 %v3602_v5 }
 0x868   :  { %3006 = vmatprep.subr.mxu0 %v3478_v0 }
 0x869   :  { %3007 = vmatpush3.msra.mxu0 %v3606_v6  ;;  %v953_v12 = vpop.permute.xlu1 %952 }
 0x86a   :  { %3000 = vmatmul.mubr.msk.f32.vlgmr.msra.gmra.mxu1 %vm218_vm2, %v953_v12  ;;  %3008 = vmatprep.subr.mxu0 %v3478_v0 }
 0x86b   :  { %3009 = vmatpush3.msra.mxu0 %v3611_v7  ;;  %3014 = vmatpush3.msra.mxu1 %v3637_v30 }
 0x86c   :  { %3011 = vmatmul.mubr.msk.f32.vlgmr.msra.gmra.mxu0 %vm218_vm2, %v953_v12  ;;  %3024 = vmatprep.subr.mxu0 %v3478_v0 }
 0x86d   :  { %3015 = vmatprep.subr.mxu1 %v3478_v0  ;;  %3025 = vmatpush3.msra.mxu0 %v3648_v32 }
 0x86e   :  { %3016 = vmatpush3.msra.mxu1 %v3642_v31  ;;  %3026 = vmatprep.subr.mxu0 %v3478_v0 }
 0x86f   :  { %3017 = vmatprep.subr.mxu1 %v3478_v0  ;;  %3027 = vmatpush3.msra.mxu0 %v3660_v34 }
 0x870   :  { %3018 = vmatpush3.msra.mxu1 %v3654_v33  ;;  %3028 = vmatprep.subr.mxu0 %v3478_v0 }
 0x871   :  { %3019 = vmatprep.subr.mxu1 %v3478_v0  ;;  %3029 = vmatpush3.msra.mxu0 %v3667_v35 }
 0x872   :  { %3020 = vmatpush3.msra.mxu1 %v3673_v36  ;;  %3030 = vmatprep.subr.mxu0 %v3478_v0 }
 0x873   :  { %3031 = vmatpush3.msra.mxu0 %v3686_v38  ;;  %3032 = vmatprep.mubr.msk.f32.mxu0 %vm3479_vm0, %v3478_v0 }
 0x874   :  { %3021 = vmatprep.mubr.msk.f32.mxu1 %vm3479_vm0, %v3478_v0  ;;  %3035 = vmatprep.subr.mxu1 %v3478_v0 }
 0x875   :  { %3046 = vmatprep.subr.mxu0 %v3478_v0 }
 0x924   :  { %v947_v13 = vpop.f32.mrf.mxu0 }
 0x926   :  { %v2990_v14 = vpop.f32.mrf.mxu0 }
 0x92a   :  { %v1022_v15 = vpop.f32.mrf.mxu1 }
 0x92b   :  { %v1023_v16 = vadd.f32 %v1022_v15, %v947_v13 }
 0x92c   :  { %v3001_v17 = vpop.f32.mrf.mxu1  ;;  %v1123_v19 = vpop.f32.mrf.mxu0 }
 0x92d   :  { %v1026_v20 = vadd.f32 %v3728_v45, %v1023_v16  ;;  %v1127_v21 = vadd.f32 %v1123_v19, %v1056_v18 }
 0x92e   :  { %v3012_v22 = vpop.f32.mrf.mxu0 }
 0x92f   :  { %3239 = vtanh.f32 %v1026_v20  ;;  %v2731_v25 = vmul.f32 -1.442695, %v1026_v20  ;;  %v2733_v26 = vmul.f32 -1.442695, %v1127_v21 }
 0x930   :  { %3241 = vtanh.f32 %v1127_v21 }
 0x931   :  { %3243 = vpow2.f32 %v2731_v25 }
 0x932   :  { %3245 = vpow2.f32 %v2733_v26 }
 0x93c   :  { %v3240_v23 = vpop.eup %3239 }
 0x93d   :  { %v3242_v24 = vpop.eup %3241  ;;  %1036 = vrot.lane.b32.xlu0 %v3240_v23, %s3480_s26 }
 0x93e   :  { %1137 = vrot.lane.b32.xlu1 %v3242_v24, %s3480_s26  ;;  %v3244_v27 = vpop.eup %3243 }
 0x93f   :  { %v3246_v28 = vpop.eup %3245  ;;  %v1030_v29 = vadd.f32 1.0, %v3244_v27 }
 0x940   :  { %v1131_v37 = vadd.f32 1.0, %v3246_v28 }
 0x941   :  { %3247 = vrcp.f32 %v1030_v29 }
 0x942   :  { %3249 = vrcp.f32 %v1131_v37 }
 0x94e   :  { %v3248_v39 = vpop.eup %3247 }
 0x94f   :  { %v3250_v41 = vpop.eup %3249  ;;  %v1034_v46 = vmul.f32 %v3248_v39, %v3790_v60 }
 0x950   :  { %v1135_v47 = vmul.f32 %v3250_v41, %v3794_v63 }
 0x9af   :  { %v1037_v40 = vpop.permute.xlu0 %1036 }
 0x9b0   :  { %v1138_v42 = vpop.permute.xlu1 %1137  ;;  %v1039_v43 = vmul.f32 %v3248_v39, %v1037_v40 }
 0x9b1   :  { %v1140_v44 = vmul.f32 %v3250_v41, %v1138_v42 }
 0x9b2   :  { %1041 = vrot.lane.b32.xlu0 %v1039_v43, %s3481_s28 }
 0x9b3   :  { %1142 = vrot.lane.b32.xlu1 %v1140_v44, %s3481_s28 }
 0xa24   :  { %v1042_v48 = vpop.permute.xlu0 %1041 }
 0xa25   :  { %v1143_v49 = vpop.permute.xlu1 %1142  ;;  %v3842_v50 = vadd.f32 %v1042_v48, %v1034_v46 }
 0xa26   :  { %v3844_v51 = vadd.f32 %v1143_v49, %v1135_v47 }
 0xa27   :  { %3251 = vtanh.f32 %v3842_v50 }
 0xa28   :  { %3253 = vtanh.f32 %v3844_v51 }
 0xa34   :  { %v3252_v52 = vpop.eup %3251 }
 0xa35   :  { %v3254_v53 = vpop.eup %3253  ;;  %1047 = vrot.lane.b32.xlu0 %v3252_v52, %s3480_s26 }
 0xa36   :  { %1148 = vrot.lane.b32.xlu1 %v3254_v53, %s3480_s26 }
 0xaa7   :  { %v1048_v54 = vpop.permute.xlu0 %1047 }
 0xaa8   :  { %v1149_v55 = vpop.permute.xlu1 %1148  ;;  %v1050_v56 = vmul.f32 %v3248_v39, %v1048_v54 }
 0xaa9   :  { %v1151_v57 = vmul.f32 %v3250_v41, %v1149_v55 }
 0xaaa   :  { %1052 = vrot.lane.b32.xlu0 %v1050_v56, %s3481_s28 }
 0xaab   :  { %1225 = vrot.lane.b32.xlu1 %v1151_v57, %s3481_s28 }
 0xb1c   :  { %v1053_v58 = vpop.permute.xlu0 %1052 }
 0xb1d   :  { %v1226_v59 = vpop.permute.xlu1 %1225  ;;  %1055 = vst.msk [vmem:[#allocation2 + $0x4] sm:$0x3] %vm508_vm3, %v1053_v58  ;;  %3022 = vmatmul.mubr.msk.f32.vlgmr.msra.gmra.mxu1 %vm218_vm2, %v1053_v58 }
 0xb1e   :  { %3033 = vmatmul.mubr.msk.f32.vlgmr.msra.gmra.mxu0 %vm218_vm2, %v1226_v59  ;;  %3036 = vmatpush3.msra.mxu1 %v3600_v4 }
 0xb1f   :  { %3037 = vmatprep.subr.mxu1 %v3478_v0  ;;  %3043 = vmatprep.mubr.msk.f32.mxu1 %vm3479_vm0, %v3478_v0 }
 0xb20   :  { %3038 = vmatpush3.msra.mxu1 %v3602_v5  ;;  %3047 = vmatpush3.msra.mxu0 %v3637_v30 }
 0xb21   :  { %3039 = vmatprep.subr.mxu1 %v3478_v0  ;;  %3048 = vmatprep.subr.mxu0 %v3478_v0 }
 0xb22   :  { %3040 = vmatpush3.msra.mxu1 %v3606_v6  ;;  %3049 = vmatpush3.msra.mxu0 %v3642_v31 }
 0xb23   :  { %3041 = vmatprep.subr.mxu1 %v3478_v0  ;;  %3050 = vmatprep.subr.mxu0 %v3478_v0 }
 0xb24   :  { %3042 = vmatpush3.msra.mxu1 %v3611_v7  ;;  %3051 = vmatpush3.msra.mxu0 %v3654_v33 }
 0xb25   :  { %3044 = vmatmul.mubr.msk.f32.vlgmr.msra.gmra.mxu1 %vm218_vm2, %v1226_v59  ;;  %3052 = vmatprep.subr.mxu0 %v3478_v0 }
 0xb26   :  { %3057 = vmatprep.subr.mxu1 %v3478_v0  ;;  %3053 = vmatpush3.msra.mxu0 %v3673_v36 }
 0xb27   :  { %3058 = vmatpush3.msra.mxu1 %v3648_v32  ;;  %3054 = vmatprep.mubr.msk.f32.mxu0 %vm3479_vm0, %v3478_v0 }
 0xb28   :  { %3059 = vmatprep.subr.mxu1 %v3478_v0  ;;  %3068 = vmatprep.subr.mxu0 %v3478_v0 }
 0xb29   :  { %3060 = vmatpush3.msra.mxu1 %v3660_v34  ;;  %3065 = vmatprep.mubr.msk.f32.mxu1 %vm3479_vm0, %v3478_v0 }
 0xb2a   :  { %3061 = vmatprep.subr.mxu1 %v3478_v0 }
 0xb2b   :  { %3062 = vmatpush3.msra.mxu1 %v3667_v35 }
 0xb2c   :  { %3063 = vmatprep.subr.mxu1 %v3478_v0 }
 0xb2d   :  { %3064 = vmatpush3.msra.mxu1 %v3686_v38 }
 0xb2e   :  { %3079 = vmatprep.subr.mxu1 %v3478_v0 }
 0xbdd   :  { %v1220_v60 = vpop.f32.mrf.mxu1 }
 0xbde   :  { %v1295_v61 = vpop.f32.mrf.mxu0 }
 0xbdf   :  { %v1296_v62 = vadd.f32 %v1295_v61, %v1220_v60  ;;  %v3023_v63 = vpop.f32.mrf.mxu1 }
 0xbe0   :  { %v3034_v1 = vpop.f32.mrf.mxu0 }
 0xbe1   :  { %v1299_v2 = vadd.f32 %v3728_v45, %v1296_v62 }
 0xbe3   :  { %3255 = vtanh.f32 %v1299_v2  ;;  %v2736_v13 = vmul.f32 -1.442695, %v1299_v2 }
 0xbe5   :  { %v1396_v8 = vpop.f32.mrf.mxu1 }
 0xbe6   :  { %v1400_v9 = vadd.f32 %v1396_v8, %v1329_v3 }
 0xbe7   :  { %v3045_v10 = vpop.f32.mrf.mxu1 }
 0xbe8   :  { %3257 = vtanh.f32 %v1400_v9  ;;  %v2738_v14 = vmul.f32 -1.442695, %v1400_v9 }
 0xbe9   :  { %3259 = vpow2.f32 %v2736_v13 }
 0xbea   :  { %3261 = vpow2.f32 %v2738_v14 }
 0xbf0   :  { %v3256_v11 = vpop.eup %3255 }
 0xbf1   :  { %1309 = vrot.lane.b32.xlu0 %v3256_v11, %s3480_s26 }
 0xbf5   :  { %v3258_v12 = vpop.eup %3257 }
 0xbf6   :  { %1410 = vrot.lane.b32.xlu1 %v3258_v12, %s3480_s26  ;;  %v3260_v15 = vpop.eup %3259 }
 0xbf7   :  { %v1303_v16 = vadd.f32 1.0, %v3260_v15  ;;  %v3262_v17 = vpop.eup %3261 }
 0xbf8   :  { %v1404_v18 = vadd.f32 1.0, %v3262_v17 }
 0xbf9   :  { %3263 = vrcp.f32 %v1303_v16 }
 0xbfa   :  { %3265 = vrcp.f32 %v1404_v18 }
 0xc06   :  { %v3264_v19 = vpop.eup %3263 }
 0xc07   :  { %v3266_v22 = vpop.eup %3265  ;;  %v1307_v25 = vmul.f32 %v3264_v19, %v3842_v50  ;;  %v1602_v50 = vld [vmem:[#allocation3 + $0xa] sm:$0x3] }
 0xc08   :  { %v1408_v28 = vmul.f32 %v3266_v22, %v3844_v51 }
 0xc63   :  { %v1310_v20 = vpop.permute.xlu0 %1309 }
 0xc64   :  { %v1312_v21 = vmul.f32 %v3264_v19, %v1310_v20 }
 0xc66   :  { %1314 = vrot.lane.b32.xlu0 %v1312_v21, %s3481_s28 }
 0xc68   :  { %v1411_v23 = vpop.permute.xlu1 %1410 }
 0xc69   :  { %v1413_v24 = vmul.f32 %v3266_v22, %v1411_v23  ;;  %v3957_v23 = vld [vmem:[#allocation4 + $0x18] sm:$0xff] }
 0xc6b   :  { %1415 = vrot.lane.b32.xlu1 %v1413_v24, %s3481_s28  ;;  %v3963_v24 = vld [vmem:[#allocation4 + $0x10] sm:$0xff] }
 0xcd8   :  { %v1315_v26 = vpop.permute.xlu0 %1314 }
 0xcd9   :  { %v3892_v27 = vadd.f32 %v1315_v26, %v1307_v25  ;;  %v3969_v25 = vld [vmem:[#allocation4 + $0x8] sm:$0xff]  ;;  %v3975_v26 = vld [vmem:[#allocation4] sm:$0xff] }
 0xcdb   :  { %3267 = vtanh.f32 %v3892_v27 }
 0xcdd   :  { %v1416_v29 = vpop.permute.xlu1 %1415 }
 0xcde   :  { %v3896_v37 = vadd.f32 %v1416_v29, %v1408_v28 }
 0xce0   :  { %3269 = vtanh.f32 %v3896_v37 }
 0xce8   :  { %v3268_v39 = vpop.eup %3267 }
 0xce9   :  { %1320 = vrot.lane.b32.xlu0 %v3268_v39, %s3480_s26 }
 0xced   :  { %v3270_v40 = vpop.eup %3269 }
 0xcee   :  { %1421 = vrot.lane.b32.xlu1 %v3270_v40, %s3480_s26 }
 0xd5b   :  { %v1321_v41 = vpop.permute.xlu0 %1320 }
 0xd5c   :  { %v1323_v42 = vmul.f32 %v3264_v19, %v1321_v41 }
 0xd5e   :  { %1325 = vrot.lane.b32.xlu0 %v1323_v42, %s3481_s28 }
 0xd60   :  { %v1422_v43 = vpop.permute.xlu1 %1421 }
 0xd61   :  { %v1424_v44 = vmul.f32 %v3266_v22, %v1422_v43 }
 0xd63   :  { %1498 = vrot.lane.b32.xlu1 %v1424_v44, %s3481_s28 }
 0xdd0   :  { %v1326_v46 = vpop.permute.xlu0 %1325 }
 0xdd1   :  { %1328 = vst.msk [vmem:[#allocation2 + $0x6] sm:$0x3] %vm508_vm3, %v1326_v46  ;;  %3055 = vmatmul.mubr.msk.f32.vlgmr.msra.gmra.mxu0 %vm218_vm2, %v1326_v46 }
 0xdd2   :  { %3069 = vmatpush3.msra.mxu0 %v3600_v4  ;;  %3076 = vmatprep.mubr.msk.f32.mxu0 %vm3479_vm0, %v3478_v0 }
 0xdd3   :  { %3070 = vmatprep.subr.mxu0 %v3478_v0 }
 0xdd4   :  { %3071 = vmatpush3.msra.mxu0 %v3602_v5 }
 0xdd5   :  { %3072 = vmatprep.subr.mxu0 %v3478_v0  ;;  %v1499_v47 = vpop.permute.xlu1 %1498 }
 0xdd6   :  { %3073 = vmatpush3.msra.mxu0 %v3606_v6  ;;  %3066 = vmatmul.mubr.msk.f32.vlgmr.msra.gmra.mxu1 %vm218_vm2, %v1499_v47 }
 0xdd7   :  { %3074 = vmatprep.subr.mxu0 %v3478_v0  ;;  %3080 = vmatpush3.msra.mxu1 %v3637_v30 }
 0xdd8   :  { %3075 = vmatpush3.msra.mxu0 %v3611_v7  ;;  %3081 = vmatprep.subr.mxu1 %v3478_v0 }
 0xdd9   :  { %3077 = vmatmul.mubr.msk.f32.vlgmr.msra.gmra.mxu0 %vm218_vm2, %v1499_v47  ;;  %3090 = vmatprep.subr.mxu0 %v3478_v0 }
 0xdda   :  { %3091 = vmatpush3.msra.mxu0 %v3648_v32  ;;  %3082 = vmatpush3.msra.mxu1 %v3642_v31 }
 0xddb   :  { %3092 = vmatprep.subr.mxu0 %v3478_v0  ;;  %3083 = vmatprep.subr.mxu1 %v3478_v0 }
 0xddc   :  { %3093 = vmatpush3.msra.mxu0 %v3660_v34  ;;  %3084 = vmatpush3.msra.mxu1 %v3654_v33 }
 0xddd   :  { %3094 = vmatprep.subr.mxu0 %v3478_v0  ;;  %3085 = vmatprep.subr.mxu1 %v3478_v0 }
 0xdde   :  { %3095 = vmatpush3.msra.mxu0 %v3667_v35  ;;  %3086 = vmatpush3.msra.mxu1 %v3673_v36 }
 0xddf   :  { %3096 = vmatprep.subr.mxu0 %v3478_v0  ;;  %3098 = vmatprep.mubr.msk.f32.mxu0 %vm3479_vm0, %v3478_v0 }
 0xde0   :  { %3097 = vmatpush3.msra.mxu0 %v3686_v38  ;;  %3087 = vmatprep.mubr.msk.f32.mxu1 %vm3479_vm0, %v3478_v0 }
 0xde1   :  { %3101 = vmatprep.subr.mxu1 %v3478_v0  ;;  %3112 = vmatprep.subr.mxu0 %v3478_v0 }
 0xe91   :  { %v1493_v4 = vpop.f32.mrf.mxu0 }
 0xe93   :  { %v3056_v5 = vpop.f32.mrf.mxu0 }
 0xe96   :  { %v1568_v6 = vpop.f32.mrf.mxu1 }
 0xe97   :  { %v1569_v7 = vadd.f32 %v1568_v6, %v1493_v4 }
 0xe98   :  { %v3067_v48 = vpop.f32.mrf.mxu1 }
 0xe99   :  { %v1572_v49 = vadd.f32 %v3728_v45, %v1569_v7  ;;  %v1669_v51 = vpop.f32.mrf.mxu0 }
 0xe9a   :  { %v1673_v52 = vadd.f32 %v1669_v51, %v1602_v50 }
 0xe9b   :  { %3271 = vtanh.f32 %v1572_v49  ;;  %v3078_v53 = vpop.f32.mrf.mxu0  ;;  %v2741_v56 = vmul.f32 -1.442695, %v1572_v49 }
 0xe9c   :  { %3273 = vtanh.f32 %v1673_v52  ;;  %v2743_v57 = vmul.f32 -1.442695, %v1673_v52 }
 0xe9d   :  { %3275 = vpow2.f32 %v2741_v56 }
 0xe9e   :  { %3277 = vpow2.f32 %v2743_v57 }
 0xea8   :  { %v3272_v54 = vpop.eup %3271 }
 0xea9   :  { %v3274_v55 = vpop.eup %3273  ;;  %1582 = vrot.lane.b32.xlu0 %v3272_v54, %s3480_s26 }
 0xeaa   :  { %1683 = vrot.lane.b32.xlu1 %v3274_v55, %s3480_s26  ;;  %v3276_v58 = vpop.eup %3275 }
 0xeab   :  { %v3278_v59 = vpop.eup %3277  ;;  %v1576_v60 = vadd.f32 1.0, %v3276_v58 }
 0xeac   :  { %v1677_v61 = vadd.f32 1.0, %v3278_v59 }
 0xead   :  { %3279 = vrcp.f32 %v1576_v60 }
 0xeae   :  { %3281 = vrcp.f32 %v1677_v61  ;;  %v3333_v61 = vld [vmem:[%s4139_s5 + $0x18] sm:$0xff] }
 0xeba   :  { %v3280_v62 = vpop.eup %3279 }
 0xebb   :  { %v3282_v1 = vpop.eup %3281  ;;  %v1580_v9 = vmul.f32 %v3280_v62, %v3892_v27  ;;  %v1875_v27 = vld [vmem:[#allocation3 + $0xc] sm:$0x3] }
 0xebc   :  { %v1681_v10 = vmul.f32 %v3282_v1, %v3896_v37 }
 0xf1b   :  { %v1583_v63 = vpop.permute.xlu0 %1582 }
 0xf1c   :  { %v1684_v2 = vpop.permute.xlu1 %1683  ;;  %v1585_v3 = vmul.f32 %v3280_v62, %v1583_v63  ;;  %v3335_v63 = vld [vmem:[%s4139_s5 + $0x10] sm:$0xff] }
 0xf1d   :  { %v1686_v8 = vmul.f32 %v3282_v1, %v1684_v2  ;;  %v3337_v2 = vld [vmem:[%s4139_s5 + $0x8] sm:$0xff] }
 0xf1e   :  { %1587 = vrot.lane.b32.xlu0 %v1585_v3, %s3481_s28  ;;  %v3338_v3 = vld [vmem:[%s4138_s4 + $0x8] sm:$0xff] }
 0xf1f   :  { %1688 = vrot.lane.b32.xlu1 %v1686_v8, %s3481_s28  ;;  %v3339_v8 = vld [vmem:[%s4139_s5] sm:$0xff] }
 0xf90   :  { %v1588_v11 = vpop.permute.xlu0 %1587 }
 0xf91   :  { %v1689_v12 = vpop.permute.xlu1 %1688  ;;  %v3944_v13 = vadd.f32 %v1588_v11, %v1580_v9  ;;  %v3340_v9 = vld [vmem:[%s4138_s4] sm:$0xff] }
 0xf92   :  { %v3946_v14 = vadd.f32 %v1689_v12, %v1681_v10 }
 0xf93   :  { %3283 = vtanh.f32 %v3944_v13 }
 0xf94   :  { %3285 = vtanh.f32 %v3946_v14 }
 0xfa0   :  { %v3284_v15 = vpop.eup %3283 }
 0xfa1   :  { %v3286_v16 = vpop.eup %3285  ;;  %1593 = vrot.lane.b32.xlu0 %v3284_v15, %s3480_s26  ;;  %v3341_v15 = vld [vmem:[#allocation9] ss:$0 sm:$0xff] }
 0xfa2   :  { %1694 = vrot.lane.b32.xlu1 %v3286_v16, %s3480_s26 }
0x1013   :  { %v1594_v17 = vpop.permute.xlu0 %1593 }
0x1014   :  { %v1695_v18 = vpop.permute.xlu1 %1694  ;;  %v1596_v19 = vmul.f32 %v3280_v62, %v1594_v17  ;;  %v3334_v62 = vld [vmem:[%s4138_s4 + $0x18] sm:$0xff] }
0x1015   :  { %v1697_v20 = vmul.f32 %v3282_v1, %v1695_v18  ;;  %v3336_v1 = vld [vmem:[%s4138_s4 + $0x10] sm:$0xff]  ;;  %v2148_v17 = vld [vmem:[#allocation3 + $0xe] sm:$0x3]  ;;  %s3482_s4 = smov 96  }
0x1016   :  { %1598 = vrot.lane.b32.xlu0 %v1596_v19, %s3481_s28 }
0x1017   :  { %1771 = vrot.lane.b32.xlu1 %v1697_v20, %s3481_s28 }
0x1088   :  { %v1599_v21 = vpop.permute.xlu0 %1598 }
0x1089   :  { %v1772_v22 = vpop.permute.xlu1 %1771  ;;  %1601 = vst.msk [vmem:[#allocation2 + $0x8] sm:$0x3] %vm508_vm3, %v1599_v21  ;;  %3088 = vmatmul.mubr.msk.f32.vlgmr.msra.gmra.mxu1 %vm218_vm2, %v1599_v21 }
0x108a   :  { %3099 = vmatmul.mubr.msk.f32.vlgmr.msra.gmra.mxu0 %vm218_vm2, %v1772_v22  ;;  %3102 = vmatpush3.msra.mxu1 %v3957_v23 }
0x108b   :  { %3103 = vmatprep.subr.mxu1 %v3478_v0  ;;  %3109 = vmatprep.mubr.msk.f32.mxu1 %vm3479_vm0, %v3478_v0 }
0x108c   :  { %3104 = vmatpush3.msra.mxu1 %v3963_v24  ;;  %3113 = vmatpush3.msra.mxu0 %v3637_v30 }
0x108d   :  { %3105 = vmatprep.subr.mxu1 %v3478_v0  ;;  %3114 = vmatprep.subr.mxu0 %v3478_v0 }
0x108e   :  { %3106 = vmatpush3.msra.mxu1 %v3969_v25  ;;  %3115 = vmatpush3.msra.mxu0 %v3642_v31 }
0x108f   :  { %3107 = vmatprep.subr.mxu1 %v3478_v0  ;;  %3116 = vmatprep.subr.mxu0 %v3478_v0 }
0x1090   :  { %3108 = vmatpush3.msra.mxu1 %v3975_v26  ;;  %3117 = vmatpush3.msra.mxu0 %v3654_v33 }
0x1091   :  { %3110 = vmatmul.mubr.msk.f32.vlgmr.msra.gmra.mxu1 %vm218_vm2, %v1772_v22  ;;  %3118 = vmatprep.subr.mxu0 %v3478_v0 }
0x1092   :  { %3123 = vmatprep.subr.mxu1 %v3478_v0  ;;  %3119 = vmatpush3.msra.mxu0 %v3673_v36 }
0x1093   :  { %3124 = vmatpush3.msra.mxu1 %v3648_v32  ;;  %3120 = vmatprep.mubr.msk.f32.mxu0 %vm3479_vm0, %v3478_v0 }
0x1094   :  { %3125 = vmatprep.subr.mxu1 %v3478_v0  ;;  %3134 = vmatprep.subr.mxu0 %v3478_v0 }
0x1095   :  { %3126 = vmatpush3.msra.mxu1 %v3660_v34  ;;  %3131 = vmatprep.mubr.msk.f32.mxu1 %vm3479_vm0, %v3478_v0 }
0x1096   :  { %3127 = vmatprep.subr.mxu1 %v3478_v0 }
0x1097   :  { %3128 = vmatpush3.msra.mxu1 %v3667_v35 }
0x1098   :  { %3129 = vmatprep.subr.mxu1 %v3478_v0 }
0x1099   :  { %3130 = vmatpush3.msra.mxu1 %v3686_v38 }
0x109a   :  { %3145 = vmatprep.subr.mxu1 %v3478_v0 }
0x1149   :  { %v1766_v30 = vpop.f32.mrf.mxu1 }
0x114a   :  { %v1841_v31 = vpop.f32.mrf.mxu0 }
0x114b   :  { %v1842_v32 = vadd.f32 %v1841_v31, %v1766_v30  ;;  %v3089_v33 = vpop.f32.mrf.mxu1 }
0x114c   :  { %v3100_v36 = vpop.f32.mrf.mxu0 }
0x114d   :  { %v1845_v34 = vadd.f32 %v3728_v45, %v1842_v32 }
0x114f   :  { %3287 = vtanh.f32 %v1845_v34  ;;  %v2746_v38 = vmul.f32 -1.442695, %v1845_v34 }
0x1151   :  { %v1942_v28 = vpop.f32.mrf.mxu1 }
0x1152   :  { %v1946_v29 = vadd.f32 %v1942_v28, %v1875_v27 }
0x1153   :  { %v3111_v37 = vpop.f32.mrf.mxu1 }
0x1154   :  { %3289 = vtanh.f32 %v1946_v29  ;;  %v2748_v40 = vmul.f32 -1.442695, %v1946_v29 }
0x1155   :  { %3291 = vpow2.f32 %v2746_v38 }
0x1156   :  { %3293 = vpow2.f32 %v2748_v40 }
0x115c   :  { %v3288_v35 = vpop.eup %3287 }
0x115d   :  { %1855 = vrot.lane.b32.xlu0 %v3288_v35, %s3480_s26 }
0x1161   :  { %v3290_v39 = vpop.eup %3289 }
0x1162   :  { %1956 = vrot.lane.b32.xlu1 %v3290_v39, %s3480_s26  ;;  %v3292_v41 = vpop.eup %3291 }
0x1163   :  { %v1849_v42 = vadd.f32 1.0, %v3292_v41  ;;  %v3294_v43 = vpop.eup %3293 }
0x1164   :  { %v1950_v45 = vadd.f32 1.0, %v3294_v43 }
0x1165   :  { %3295 = vrcp.f32 %v1849_v42 }
0x1166   :  { %3297 = vrcp.f32 %v1950_v45 }
0x1172   :  { %v3296_v44 = vpop.eup %3295 }
0x1173   :  { %v3298_v4 = vpop.eup %3297  ;;  %v1853_v7 = vmul.f32 %v3296_v44, %v3944_v13 }
0x1174   :  { %v1954_v50 = vmul.f32 %v3298_v4, %v3946_v14 }
0x11cf   :  { %v1856_v46 = vpop.permute.xlu0 %1855 }
0x11d0   :  { %v1858_v47 = vmul.f32 %v3296_v44, %v1856_v46 }
0x11d2   :  { %1860 = vrot.lane.b32.xlu0 %v1858_v47, %s3481_s28 }
0x11d4   :  { %v1957_v5 = vpop.permute.xlu1 %1956 }
0x11d5   :  { %v1959_v6 = vmul.f32 %v3298_v4, %v1957_v5 }
0x11d7   :  { %1961 = vrot.lane.b32.xlu1 %v1959_v6, %s3481_s28 }
0x1244   :  { %v1861_v48 = vpop.permute.xlu0 %1860 }
0x1245   :  { %v4002_v49 = vadd.f32 %v1861_v48, %v1853_v7 }
0x1247   :  { %3299 = vtanh.f32 %v4002_v49 }
0x1249   :  { %v1962_v51 = vpop.permute.xlu1 %1961 }
0x124a   :  { %v4006_v52 = vadd.f32 %v1962_v51, %v1954_v50 }
0x124c   :  { %3301 = vtanh.f32 %v4006_v52 }
0x1254   :  { %v3300_v53 = vpop.eup %3299 }
0x1255   :  { %1866 = vrot.lane.b32.xlu0 %v3300_v53, %s3480_s26 }
0x1259   :  { %v3302_v54 = vpop.eup %3301 }
0x125a   :  { %1967 = vrot.lane.b32.xlu1 %v3302_v54, %s3480_s26 }
0x12c7   :  { %v1867_v55 = vpop.permute.xlu0 %1866 }
0x12c8   :  { %v1869_v56 = vmul.f32 %v3296_v44, %v1867_v55 }
0x12ca   :  { %1871 = vrot.lane.b32.xlu0 %v1869_v56, %s3481_s28 }
0x12cc   :  { %v1968_v57 = vpop.permute.xlu1 %1967 }
0x12cd   :  { %v1970_v58 = vmul.f32 %v3298_v4, %v1968_v57  ;;  %v2436_v4 = vld [vmem:[#allocation2] sm:$0xff] }
0x12cf   :  { %2044 = vrot.lane.b32.xlu1 %v1970_v58, %s3481_s28 }
0x133c   :  { %v1872_v59 = vpop.permute.xlu0 %1871 }
0x133d   :  { %1874 = vst.msk [vmem:[#allocation2 + $0xa] sm:$0x3] %vm508_vm3, %v1872_v59  ;;  %3121 = vmatmul.mubr.msk.f32.vlgmr.msra.gmra.mxu0 %vm218_vm2, %v1872_v59 }
0x133e   :  { %3135 = vmatpush3.msra.mxu0 %v3957_v23  ;;  %3142 = vmatprep.mubr.msk.f32.mxu0 %vm3479_vm0, %v3478_v0 }
0x133f   :  { %3136 = vmatprep.subr.mxu0 %v3478_v0 }
0x1340   :  { %3137 = vmatpush3.msra.mxu0 %v3963_v24 }
0x1341   :  { %3138 = vmatprep.subr.mxu0 %v3478_v0  ;;  %v2045_v60 = vpop.permute.xlu1 %2044 }
0x1342   :  { %3139 = vmatpush3.msra.mxu0 %v3969_v25  ;;  %3132 = vmatmul.mubr.msk.f32.vlgmr.msra.gmra.mxu1 %vm218_vm2, %v2045_v60 }
0x1343   :  { %3140 = vmatprep.subr.mxu0 %v3478_v0  ;;  %3146 = vmatpush3.msra.mxu1 %v3333_v61 }
0x1344   :  { %3141 = vmatpush3.msra.mxu0 %v3975_v26  ;;  %3147 = vmatprep.subr.mxu1 %v3478_v0 }
0x1345   :  { %3143 = vmatmul.mubr.msk.f32.vlgmr.msra.gmra.mxu0 %vm218_vm2, %v2045_v60  ;;  %3156 = vmatprep.subr.mxu0 %v3478_v0 }
0x1346   :  { %3157 = vmatpush3.msra.mxu0 %v3334_v62  ;;  %3148 = vmatpush3.msra.mxu1 %v3335_v63  ;;  %v2441_v62 = vld [vmem:[%s4143_s9 + $0x18] sm:$0xff]  ;;  %v2440_v63 = vld [vmem:[%s4143_s9 + $0x10] sm:$0xff] }
0x1347   :  { %3158 = vmatprep.subr.mxu0 %v3478_v0  ;;  %3149 = vmatprep.subr.mxu1 %v3478_v0 }
0x1348   :  { %3159 = vmatpush3.msra.mxu0 %v3336_v1  ;;  %3150 = vmatpush3.msra.mxu1 %v3337_v2  ;;  %v2439_v1 = vld [vmem:[%s4143_s9 + $0x8] sm:$0xff]  ;;  %v2438_v2 = vld [vmem:[%s4143_s9] sm:$0xff] }
0x1349   :  { %3160 = vmatprep.subr.mxu0 %v3478_v0  ;;  %3151 = vmatprep.subr.mxu1 %v3478_v0 }
0x134a   :  { %3161 = vmatpush3.msra.mxu0 %v3338_v3  ;;  %3164 = vmatprep.mubr.msk.f32.mxu0 %vm3479_vm0, %v3478_v0 }
0x134b   :  { %3162 = vmatprep.subr.mxu0 %v3478_v0  ;;  %3152 = vmatpush3.msra.mxu1 %v3339_v8 }
0x134c   :  { %3163 = vmatpush3.msra.mxu0 %v3340_v9  ;;  %3153 = vmatprep.mubr.msk.f32.mxu1 %vm3479_vm0, %v3478_v0 }
0x134d   :  { %3167 = vmatprep.subr.mxu1 %v2441_v62 }
0x13fd   :  { %v2039_v10 = vpop.f32.mrf.mxu0 }
0x13ff   :  { %v3122_v11 = vpop.f32.mrf.mxu0 }
0x1402   :  { %v2114_v12 = vpop.f32.mrf.mxu1 }
0x1403   :  { %v2115_v13 = vadd.f32 %v2114_v12, %v2039_v10 }
0x1404   :  { %v3133_v14 = vpop.f32.mrf.mxu1 }
0x1405   :  { %v2118_v16 = vadd.f32 %v3341_v15, %v2115_v13  ;;  %v2215_v18 = vpop.f32.mrf.mxu0  ;;  %v2581_v13 = vld [vmem:[%s4147_s13 + $0x8] sm:$0xff]  ;;  %v2580_v14 = vld [vmem:[%s4147_s13] sm:$0xff] }
0x1406   :  { %v2219_v19 = vadd.f32 %v2215_v18, %v2148_v17  ;;  %3178 = vmatprep.subr.mxu0 %v2581_v13 }
0x1407   :  { %3303 = vtanh.f32 %v2118_v16  ;;  %v3144_v20 = vpop.f32.mrf.mxu0  ;;  %v2751_v0 = vmul.f32 -1.442695, %v2118_v16 }
0x1408   :  { %3305 = vtanh.f32 %v2219_v19  ;;  %v2753_v23 = vmul.f32 -1.442695, %v2219_v19 }
0x1409   :  { %3307 = vpow2.f32 %v2751_v0 }
0x140a   :  { %3309 = vpow2.f32 %v2753_v23 }
0x1414   :  { %v3304_v21 = vpop.eup %3303 }
0x1415   :  { %v3306_v22 = vpop.eup %3305  ;;  %2128 = vrot.lane.b32.xlu0 %v3304_v21, %s3480_s26 }
0x1416   :  { %2229 = vrot.lane.b32.xlu1 %v3306_v22, %s3480_s26  ;;  %v3308_v24 = vpop.eup %3307 }
0x1417   :  { %v3310_v25 = vpop.eup %3309  ;;  %v2122_v26 = vadd.f32 1.0, %v3308_v24 }
0x1418   :  { %v2223_v30 = vadd.f32 1.0, %v3310_v25 }
0x1419   :  { %3311 = vrcp.f32 %v2122_v26 }
0x141a   :  { %3313 = vrcp.f32 %v2223_v30 }
0x1426   :  { %v3312_v31 = vpop.eup %3311 }
0x1427   :  { %v3314_v33 = vpop.eup %3313  ;;  %v2126_v28 = vmul.f32 %v3312_v31, %v4002_v49 }
0x1428   :  { %v2227_v29 = vmul.f32 %v3314_v33, %v4006_v52 }
0x1487   :  { %v2129_v32 = vpop.permute.xlu0 %2128 }
0x1488   :  { %v2230_v36 = vpop.permute.xlu1 %2229  ;;  %v2131_v34 = vmul.f32 %v3312_v31, %v2129_v32 }
0x1489   :  { %v2232_v27 = vmul.f32 %v3314_v33, %v2230_v36 }
0x148a   :  { %2133 = vrot.lane.b32.xlu0 %v2131_v34, %s3481_s28 }
0x148b   :  { %2234 = vrot.lane.b32.xlu1 %v2232_v27, %s3481_s28 }
0x14fc   :  { %v2134_v37 = vpop.permute.xlu0 %2133 }
0x14fd   :  { %v2235_v35 = vpop.permute.xlu1 %2234  ;;  %v2136_v39 = vadd.f32 %v2134_v37, %v2126_v28 }
0x14fe   :  { %v2237_v38 = vadd.f32 %v2235_v35, %v2227_v29 }
0x14ff   :  { %3315 = vtanh.f32 %v2136_v39 }
0x1500   :  { %3317 = vtanh.f32 %v2237_v38 }
0x150c   :  { %v3316_v40 = vpop.eup %3315 }
0x150d   :  { %v3318_v41 = vpop.eup %3317  ;;  %2139 = vrot.lane.b32.xlu0 %v3316_v40, %s3480_s26 }
0x150e   :  { %2240 = vrot.lane.b32.xlu1 %v3318_v41, %s3480_s26 }
0x157f   :  { %v2140_v42 = vpop.permute.xlu0 %2139 }
0x1580   :  { %v2241_v43 = vpop.permute.xlu1 %2240  ;;  %v2142_v45 = vmul.f32 %v3312_v31, %v2140_v42 }
0x1581   :  { %v2243_v44 = vmul.f32 %v3314_v33, %v2241_v43 }
0x1582   :  { %2144 = vrot.lane.b32.xlu0 %v2142_v45, %s3481_s28 }
0x1583   :  { %2317 = vrot.lane.b32.xlu1 %v2243_v44, %s3481_s28  ;;  %v2760_v44 = vld [vmem:[%s4145_s11] ss:$0 sm:$0xff]  ;;  %s2691_s11 = sshll.u32 %s3484_s22, 4  ;;  %s2692_s11 = int_to_ptr.vmem [resolvable:$true] %s2691_s11 }
0x15f4   :  { %v2145_v46 = vpop.permute.xlu0 %2144 }
0x15f5   :  { %v2318_v47 = vpop.permute.xlu1 %2317  ;;  %2147 = vst.msk [vmem:[#allocation2 + $0xc] sm:$0x3] %vm508_vm3, %v2145_v46  ;;  %3154 = vmatmul.mubr.msk.f32.vlgmr.msra.gmra.mxu1 %vm218_vm2, %v2145_v46 }
0x15f6   :  { %2422 = vst.msk [vmem:[#allocation12] sm:$0x3] %vm508_vm3, %v2318_v47  ;;  %3165 = vmatmul.mubr.msk.f32.vlgmr.msra.gmra.mxu0 %vm218_vm2, %v2318_v47  ;;  %3175 = vmatprep.mubr.msk.f32.mxu1 %vm218_vm2, %v2436_v4  ;;  %v2761_v4 = vld [vmem:[%s4146_s12] ss:$0 sm:$0xff] }
0x15f7   :  { %3168 = vmatpush3.msra.mxu1 %v2441_v62  ;;  %3179 = vmatpush3.msra.mxu0 %v2581_v13 }
0x15f8   :  { %3169 = vmatprep.subr.mxu1 %v2440_v63  ;;  %3180 = vmatprep.subr.mxu0 %v2580_v14 }
0x15f9   :  { %3170 = vmatpush3.msra.mxu1 %v2440_v63  ;;  %3181 = vmatpush3.msra.mxu0 %v2580_v14 }
0x15fa   :  { %3171 = vmatprep.subr.mxu1 %v2439_v1 }
0x15fb   :  { %3172 = vmatpush3.msra.mxu1 %v2439_v1 }
0x15fc   :  { %3173 = vmatprep.subr.mxu1 %v2438_v2 }
0x15fd   :  { %3174 = vmatpush3.msra.mxu1 %v2438_v2 }
0x16b5   :  { %v2312_v5 = vpop.f32.mrf.mxu1 }
0x16b6   :  { %v2387_v6 = vpop.f32.mrf.mxu0 }
0x16b7   :  { %v2388_v7 = vadd.f32 %v2387_v6, %v2312_v5  ;;  %v3155_v48 = vpop.f32.mrf.mxu1 }
0x16b8   :  { %v3166_v49 = vpop.f32.mrf.mxu0 }
0x16b9   :  { %v2391_v50 = vadd.f32 %v3341_v15, %v2388_v7  ;;  %v2757_v15 = vld [vmem:[#allocation10] ss:$0 sm:$0xff] }
0x16bb   :  { %3319 = vtanh.f32 %v2391_v50  ;;  %v2756_v52 = vmul.f32 -1.442695, %v2391_v50 }
0x16bd   :  { %3321 = vpow2.f32 %v2756_v52 }
0x16c8   :  { %v3320_v51 = vpop.eup %3319 }
0x16c9   :  { %2401 = vrot.lane.b32.xlu0 %v3320_v51, %s3480_s26 }
0x16ca   :  { %v3322_v53 = vpop.eup %3321 }
0x16cb   :  { %v2395_v54 = vadd.f32 1.0, %v3322_v53 }
0x16cd   :  { %3323 = vrcp.f32 %v2395_v54 }
0x16da   :  { %v3324_v55 = vpop.eup %3323 }
0x16db   :  { %v2399_v58 = vmul.f32 %v3324_v55, %v2136_v39 }
0x173b   :  { %v2402_v56 = vpop.permute.xlu0 %2401 }
0x173c   :  { %v2404_v57 = vmul.f32 %v3324_v55, %v2402_v56 }
0x173e   :  { %2406 = vrot.lane.b32.xlu1 %v2404_v57, %s3481_s28 }
0x17b0   :  { %v2407_v59 = vpop.permute.xlu1 %2406 }
0x17b1   :  { %v2409_v60 = vadd.f32 %v2407_v59, %v2399_v58 }
0x17b3   :  { %3325 = vtanh.f32 %v2409_v60 }
0x17c0   :  { %v3326_v61 = vpop.eup %3325 }
0x17c1   :  { %2412 = vrot.lane.b32.xlu0 %v3326_v61, %s3480_s26 }
0x17c5   :  { %2426 = vrot.lane.b32.xlu0 %v2237_v38, %s3482_s4 }
0x1833   :  { %v2413_v3 = vpop.permute.xlu0 %2412 }
0x1834   :  { %v2415_v8 = vmul.f32 %v3324_v55, %v2413_v3 }
0x1836   :  { %2417 = vrot.lane.b32.xlu1 %v2415_v8, %s3481_s28 }
0x1837   :  { %v2427_v9 = vpop.permute.xlu0 %2426 }
0x1838   :  { %2429 = vst.msk [vmem:[#allocation13] sm:$0x3] %vm508_vm3, %v2427_v9 }
0x183a   :  { %2431 = vrot.lane.b32.xlu1 %v2409_v60, %s3482_s4 }
0x18a8   :  { %v2418_v10 = vpop.permute.xlu1 %2417 }
0x18a9   :  { %2420 = vst.msk [vmem:[#allocation2 + $0xe] sm:$0x3] %vm508_vm3, %v2418_v10  ;;  %2424 = vst.msk [vmem:[#allocation12 + $0x2] sm:$0x3] %vm508_vm3, %v2418_v10 }
0x18ac   :  { %v2432_v11 = vpop.permute.xlu1 %2431 }
0x18ad   :  { %2435 = vst.msk [vmem:[#allocation13 + $0x2] sm:$0x3] %vm508_vm3, %v2432_v11 }
0x18b0   :  { %v2437_v12 = vld [vmem:[#allocation2 + $0x8] sm:$0xff] }
0x18b1   :  { %3176 = vmatmul.mubr.msk.f32.vlgmr.msra.gmra.mxu1 %vm218_vm2, %v2437_v12 }
0x1971   :  { %v3177_v16 = vpop.f32.mrf.mxu1 }
0x1972   :  { %v2527_v17 = vadd.f32 %v3177_v16, %v2757_v15 }
0x1973   :  { %v2521_v18 = vpop.f32.mrf.mxu1 }
0x1974   :  { %v2522_v19 = vadd.f32 %v2757_v15, %v2521_v18  ;;  %v2532_v20 = vsel %vm2530_vm4, %v2527_v17, 0.0 }
0x1976   :  { %v2531_v21 = vsel %vm2530_vm4, %v2522_v19, 0.0 }
0x1977   :  { %v2533_v22 = vadd.f32 %v2532_v20, %v2531_v21 }
0x1979   :  { %v2534_v0 = vrot.slane %v2533_v22, 4 }
0x197b   :  { %v2535_v23 = vadd.f32 %v2534_v0, %v2533_v22 }
0x197d   :  { %v2536_v24 = vrot.slane %v2535_v23, 2 }
0x197f   :  { %v2537_v25 = vadd.f32 %v2536_v24, %v2535_v23 }
0x1981   :  { %v2538_v26 = vrot.slane %v2537_v25, 1 }
0x1983   :  { %v2539_v30 = vadd.f32 %v2538_v26, %v2537_v25 }
0x1985   :  { %v2541_v31 = vmul.f32 0.0625, %v2539_v30 }
0x1987   :  { %v2542_v32 = vsub.f32 %v2522_v19, %v2541_v31  ;;  %v2543_v33 = vsub.f32 %v2527_v17, %v2541_v31 }
0x1989   :  { %v2544_v36 = vmul.f32 %v2542_v32, %v2542_v32  ;;  %v2545_v34 = vmul.f32 %v2543_v33, %v2543_v33 }
0x198b   :  { %v2546_v27 = vsel %vm2530_vm4, %v2544_v36, 0.0  ;;  %v2547_v28 = vsel %vm2530_vm4, %v2545_v34, 0.0 }
0x198c   :  { %v2548_v29 = vadd.f32 %v2547_v28, %v2546_v27 }
0x198e   :  { %v2549_v37 = vrot.slane %v2548_v29, 4 }
0x1990   :  { %v2550_v35 = vadd.f32 %v2549_v37, %v2548_v29 }
0x1992   :  { %v2551_v39 = vrot.slane %v2550_v35, 2 }
0x1994   :  { %v2552_v38 = vadd.f32 %v2551_v39, %v2550_v35 }
0x1996   :  { %v2553_v40 = vrot.slane %v2552_v38, 1 }
0x1998   :  { %v2554_v41 = vadd.f32 %v2553_v40, %v2552_v38 }
0x199a   :  { %v2555_v42 = vmul.f32 0.0625, %v2554_v41 }
0x199c   :  { %v2556_v43 = vadd.f32 1e-05, %v2555_v42 }
0x199e   :  { %3327 = vrsqrt.f32 %v2556_v43 }
0x19ab   :  { %v3328_v45 = vpop.eup %3327 }
0x19ac   :  { %v2558_v46 = vmul.f32 %v3328_v45, %v2542_v32  ;;  %v2559_v47 = vmul.f32 %v3328_v45, %v2543_v33 }
0x19ae   :  { %v2567_v5 = vmul.f32 %v2760_v44, %v2558_v46  ;;  %v2568_v6 = vmul.f32 %v2760_v44, %v2559_v47 }
0x19b0   :  { %v2576_v7 = vadd.f32 %v2761_v4, %v2567_v5  ;;  %v2577_v48 = vadd.f32 %v2761_v4, %v2568_v6 }
0x19b2   :  { %v2578_v49 = vmax.f32 %v2576_v7, 0.0  ;;  %v2579_v50 = vmax.f32 %v2577_v48, 0.0 }
0x19b4   :  { %3182 = vmatprep.mubr.msk.f32.mxu0 %vm2530_vm4, %v2578_v49 }
0x19b5   :  { %3183 = vmatmul.mubr.msk.f32.vlgmr.msra.gmra.mxu0 %vm2530_vm4, %v2579_v50 }
0x19b6   :  { %3433 = shalt.err (!%p3430_p10)
}
0x19b7   :  { %s3485_s12 = smov 2   ;;  %s3442_s25 = scalar_lea.vmem %s2692_s11, 64 }
0x19b8   :  { %2685 = dma.vmem_to_hbm [thread:$0]  %s2680_s21, 64, %s4150_s16, [#allocation6], %s3481_s28, %s3481_s28, %s3485_s12  }
0x19b9   :  { %p3443_p11 = scmp.ne.s32.totalorder %s2692_s11, %s3442_s25  ;;  %p3447_p12 = scmp.lt.s32.totalorder %s2692_s11, %s2692_s11 }
0x19ba   :  { %p3448_p13 = scmp.lt.s32.totalorder %s3442_s25, %s3442_s25 }
0x19bc   :  { %p3449_p0 = por %p3448_p13, %p3447_p12 }
0x19be   :  { %p3450_p1 = pnand %p3449_p0, %p3443_p11 }
0x19c0   :  { %3453 = shalt.err (!%p3450_p1)
}
0x19c1   :  { %2697 = dma.vmem_to_hbm [thread:$0]  %s2692_s11, 64, %s4151_s17, [#allocation14], %s3481_s28, %s3481_s28, %s3485_s12  }
0x19c2   :  { %v2762_v51 = vld [vmem:[%s4148_s14] ss:$0 sm:$0xff] }
0x1a75   :  { %v3184_v52 = vpop.f32.mrf.mxu0 }
0x1a76   :  { %v2667_v53 = vadd.f32 %v3184_v52, %v2762_v51 }
0x1a77   :  { %v2661_v54 = vpop.f32.mrf.mxu0 }
0x1a78   :  { %2671 = vst [vmem:[%s4149_s15 + $0x8] sm:$0xff] %v2667_v53  ;;  %v2662_v55 = vadd.f32 %v2762_v51, %v2661_v54 }
0x1a7a   :  { %2670 = vst [vmem:[%s4149_s15] sm:$0xff] %v2662_v55 }
0x1a7b   :  { %3468 = dma.done.wait [#allocation6], 64  }
0x1a7c   :  { %3469 = vsyncadd [#allocation6], 4294967232 }
0x1a7d   :  { %3470 = dma.done.wait [#allocation14], 64  }
0x1a7e   :  { %3471 = vsyncadd [#allocation14], 4294967232 }
0x1a7f   :  { %2706 = vsyncpa [#allocation5], 1 }
0x1a80   :  { %2707 = vsyncpa [#allocation8], 1 }
0x1a81   :  { %2708 = vsyncpa [#allocation11], 1 }
0x1a82   :  { %2709 = vsyncpa [#allocation6], 1 }
0x1a83   :  { %2710 = vsyncpa [#allocation14], 1 }

</bundles_post_ra>
